<compile_context>
chip_gen: v6e
topology: v6e:2x2x1
jax: 0.10.0
libtpu: 0.0.40
codegen_flags: <defaults>
</compile_context>

<pallas_src>
import functools

import jax
import jax.numpy as jnp
from jax.experimental import pallas as pl
from jax.experimental.pallas import tpu as pltpu


MXU_DTYPE = jnp.bfloat16      # matmul-input dtype (accumulation stays f32)
LANE = 128                    # TPU lane width
ROW_TILE = 512                # rows (= batch*seq) per grid step
LANE_BUDGET = 4096            # max lane width of one (rows, D*Oc) biaffine chunk
_MIB = 1024 * 1024


def _round_up(v, m):
    return ((v + m - 1) // m) * m


# --------------------------------------------------------------------------
# Kernel
# --------------------------------------------------------------------------
def _ner_head_kernel(x_ref, w_rd_ref, b_rd_ref, w_rd1_ref, b_rd1_ref,
                     bik_ref, ssum_ref, w_bias_ref, blb_ref,
                     w_cls_ref, b_cls_ref, a_ref,
                     o_ref, logits_scr, acc_scr,
                     *, o_chunk, n_inner, n_outer):
    bf = MXU_DTYPE
    f32 = jnp.float32
    a0 = a_ref[0]              # PReLU slope (prelu)
    a1 = a_ref[1]              # PReLU slope (prelu_1)
    c = pl.program_id(1) if n_outer > 1 else None

    x_b = x_ref[...]           # (Nt, D) bf16 hidden states ("out")

    def init():
        # logits = res_dense(prelu(x)); logits = logits + res_dense_1(logits)
        x_f = x_b.astype(f32)
        h = jnp.where(x_f > 0, x_f, a0 * x_f)
        logits = (jnp.dot(h.astype(bf), w_rd_ref[...],
                          preferred_element_type=f32) + b_rd_ref[...])
        logits = logits + (jnp.dot(logits.astype(bf), w_rd1_ref[...],
                                   preferred_element_type=f32)
                           + b_rd1_ref[...])                      # (Nt, D) f32
        logits_scr[...] = logits
        # Fused biaffine bias terms: [x | logits] @ [first_bias; second_bias].
        xl = jnp.concatenate([x_b, logits.astype(bf)], axis=1)    # (Nt, 2D)
        acc_scr[...] = (jnp.dot(xl, w_bias_ref[...],
                                preferred_element_type=f32) + blb_ref[...])

    def accumulate():
        # Biaffine main term with the o-major, pre-chunked kernel layout:
        #   answer[n, o] += sum_h (x @ K_chunk)[n, g*D + h] * logits[n, h]
        logits_b = logits_scr[...].astype(bf)
        logits_rep = (logits_b if o_chunk == 1 else
                      jnp.concatenate([logits_b] * o_chunk, axis=1))  # (Nt, D*Oc)

        def chunk(j, carry):
            first = jnp.dot(x_b, bik_ref[j],
                            preferred_element_type=f32)           # (Nt, D*Oc) f32
            prod = first.astype(bf) * logits_rep                  # bf16 product
            k = j if n_outer == 1 else c * n_inner + j
            acc_scr[...] += jnp.dot(prod, ssum_ref[k],
                                    preferred_element_type=f32)   # (Nt, O)
            return carry

        if n_inner == 1:
            chunk(0, 0)
        else:
            jax.lax.fori_loop(0, n_inner, chunk, 0)

    def finalize():
        # final = classifier(prelu_1(answer)); classifier is lane-padded.
        ans = acc_scr[...]
        h2 = jnp.where(ans > 0, ans, a1 * ans)
        o_ref[...] = (jnp.dot(h2.astype(bf), w_cls_ref[...],
                              preferred_element_type=f32) + b_cls_ref[...])

    if n_outer == 1:
        init()
        accumulate()
        finalize()
    else:
        pl.when(c == 0)(init)
        accumulate()
        pl.when(c == n_outer - 1)(finalize)


# --------------------------------------------------------------------------
# Host-side preparation / sizing heuristics
# --------------------------------------------------------------------------
def _pick_o_chunk(d, o, lane_budget=LANE_BUDGET):
    """Largest divisor Oc of O with D*Oc <= lane_budget (>= 1)."""
    oc = o
    while oc > 1 and d * oc > lane_budget:
        oc -= 1
        while o % oc:
            oc -= 1
    return oc


def _vmem_capacity_bytes():
    try:
        info = pltpu.get_tpu_info()
        cap = int(getattr(info, "vmem_capacity_bytes", 0) or 0)
        if cap > 0:
            return cap
    except Exception:
        pass
    return 64 * _MIB          # conservative default (v7x per-TensorCore VMEM)


def _estimate_vmem_bytes(n_tile, D, O, T_pad, d_oc, n_chunks, n_inner, n_outer):
    """Explicit footprint estimate: resident weights + streamed tiles +
    scratch + the per-chunk intermediates, assuming single-buffered weights."""
    bf, f32 = 2, 4
    weights = (2 * D * D * bf + 2 * D * f32 +          # res_dense / res_dense_1
               2 * D * O * bf + O * f32 +              # fused biaffine biases
               n_chunks * d_oc * O * bf +              # group-sum one-hots
               O * T_pad * bf + T_pad * f32)           # classifier
    bik = n_inner * D * d_oc * bf * (1 if n_outer == 1 else 2)
    streams = 2 * (n_tile * D * bf + n_tile * T_pad * f32)   # x / out, 2 bufs
    scratch = n_tile * D * f32 + n_tile * max(O, LANE) * f32
    interm = n_tile * d_oc * (f32 + 2 * bf) + 3 * n_tile * D * f32
    return weights + bik + streams + scratch + interm


def prepare_params(params, mxu_dtype=MXU_DTYPE, row_tile=ROW_TILE):
    """One-time host prep: o-major + chunked biaffine kernel, one-hot group-sum
    matrices, fused bias weight, lane-padded classifier, bf16 casts, and
    per-chip sizing (row tile / weight streaming) from a VMEM budget."""
    D = params["w_rd"].shape[0]
    O = params["bi_label_bias"].shape[-1]
    T = params["b_cls"].shape[-1]
    T_pad = _round_up(T, LANE)

    o_chunk = _pick_o_chunk(D, O)
    n_chunks = O // o_chunk
    d_oc = D * o_chunk

    cap = _vmem_capacity_bytes()
    vmem_limit = min(96 * _MIB, (cap * 3) // 4)
    budget = max(vmem_limit - 8 * _MIB, 16 * _MIB)

    # Keep the biaffine kernel VMEM-resident when it fits comfortably;
    # otherwise stream it over a second 'arbitrary' grid axis (v7x fallback).
    bik_bytes = n_chunks * D * d_oc * 2
    n_outer = 1
    if n_chunks > 1 and bik_bytes > budget // 2:
        n_outer = n_chunks
        for cand in range(2, n_chunks + 1):
            if n_chunks % cand == 0 and 2 * (bik_bytes // cand) <= budget // 2:
                n_outer = cand
                break
    n_inner = n_chunks // n_outer

    # Shrink the row tile until the explicit footprint fits the budget.
    while (row_tile > 64 and
           _estimate_vmem_bytes(row_tile, D, O, T_pad, d_oc,
                                n_chunks, n_inner, n_outer) > budget):
        row_tile //= 2
    row_tile = max(row_tile, 8)

    # Biaffine kernel, o-major and pre-chunked:
    #   bik[c, d, g*D + h] = kernel[d, h*O + (c*o_chunk + g)]
    bik = (params["bi_kernel"].reshape(D, D, O).transpose(0, 2, 1)
           .reshape(D, n_chunks, d_oc).transpose(1, 0, 2))

    # Per-chunk one-hot group-sum: s_sum[c, g*D + h, o] = (o == c*o_chunk + g).
    cc = jnp.arange(n_chunks)[:, None, None]
    gg = (jnp.arange(d_oc) // D)[None, :, None]
    oo = jnp.arange(O)[None, None, :]
    s_sum = (oo == cc * o_chunk + gg).astype(mxu_dtype)

    w_bias = jnp.concatenate([params["bi_first_bias"],
                              params["bi_second_bias"]], axis=0)      # (2D, O)

    w_cls = jnp.zeros((O, T_pad), jnp.float32).at[:, :T].set(params["w_cls"])
    b_cls = jnp.zeros((1, T_pad), jnp.float32).at[:, :T].set(
        params["b_cls"].reshape(1, T))

    arrays = dict(
        w_rd=params["w_rd"].astype(mxu_dtype),
        b_rd=params["b_rd"].reshape(1, D).astype(jnp.float32),
        w_rd1=params["w_rd1"].astype(mxu_dtype),
        b_rd1=params["b_rd1"].reshape(1, D).astype(jnp.float32),
        bik=bik.astype(mxu_dtype),
        s_sum=s_sum,
        w_bias=w_bias.astype(mxu_dtype),
        blb=params["bi_label_bias"].reshape(1, O).astype(jnp.float32),
        w_cls=w_cls.astype(mxu_dtype),
        b_cls=b_cls,
        prelu=jnp.stack([params["prelu_a"], params["prelu1_a"]]).astype(jnp.float32),
    )
    meta = dict(D=D, O=O, T=T, T_pad=T_pad, o_chunk=o_chunk, n_chunks=n_chunks,
                n_inner=n_inner, n_outer=n_outer, d_oc=d_oc,
                row_tile=row_tile, vmem_limit=vmem_limit)
    return arrays, meta


def _row_tiling(n_rows, row_tile):
    """Pick a row tile (multiple of 8) and pad rows; prefer >=2 (even) grid
    steps so both TensorCores get work on v7x."""
    n_tile = min(row_tile, _round_up(n_rows, 8))
    n_steps = -(-n_rows // n_tile)
    if n_steps == 1 and n_rows > 8:
        n_steps = 2
    elif n_steps > 1 and n_steps % 2:
        n_steps += 1
    if n_steps > 1:
        n_tile = _round_up(-(-n_rows // n_steps), 8)
        n_steps = -(-n_rows // n_tile)
    return n_tile, n_tile * n_steps, n_steps


# --------------------------------------------------------------------------
# Wrapper
# --------------------------------------------------------------------------
def ner_head(hidden, arrays, meta):
    """hidden: (B, S, D) encoder hidden states. Returns (B, S, n_tags) f32."""
    B, S, D = hidden.shape
    O, T, T_pad = meta["O"], meta["T"], meta["T_pad"]
    o_chunk, n_inner, n_outer = meta["o_chunk"], meta["n_inner"], meta["n_outer"]
    n_chunks, d_oc = meta["n_chunks"], meta["d_oc"]
    N = B * S

    n_tile, n_pad, n_steps = _row_tiling(N, meta["row_tile"])

    # x is the only per-step streamed operand: ship it in bf16 (every matmul
    # consumes it in bf16; elementwise work is upcast inside the kernel).
    x = hidden.reshape(N, D).astype(MXU_DTYPE)
    if n_pad != N:
        x = jnp.pad(x, ((0, n_pad - N), (0, 0)))

    grid = (n_steps, n_outer)
    kernel = functools.partial(_ner_head_kernel, o_chunk=o_chunk,
                               n_inner=n_inner, n_outer=n_outer)

    def run(single_buffer_weights):
        def const(shape):
            # Constant-index weights: single-buffer so the biaffine kernel is
            # not double-buffered in VMEM.
            if single_buffer_weights:
                return pl.BlockSpec(shape, lambda *_: (0,) * len(shape),
                                    pipeline_mode=pl.Buffered(1))
            return pl.BlockSpec(shape, lambda *_: (0,) * len(shape))

        if n_outer == 1:
            bik_spec = const((n_inner, D, d_oc))                  # resident
        else:
            bik_spec = pl.BlockSpec((n_inner, D, d_oc),
                                    lambda i, c: (c, 0, 0))       # streamed

        in_specs = [
            pl.BlockSpec((n_tile, D), lambda i, c: (i, 0)),       # x rows
            const((D, D)), const((1, D)),                         # res_dense
            const((D, D)), const((1, D)),                         # res_dense_1
            bik_spec,                                             # biaffine kernel
            const((n_chunks, d_oc, O)),                           # group-sum one-hots
            const((2 * D, O)), const((1, O)),                     # fused biases, label bias
            const((O, T_pad)), const((1, T_pad)),                 # classifier (lane-padded)
            pl.BlockSpec(memory_space=pltpu.MemorySpace.SMEM),    # PReLU slopes
        ]
        out_specs = pl.BlockSpec((n_tile, T_pad), lambda i, c: (i, 0))

        return pl.pallas_call(
            kernel,
            out_shape=jax.ShapeDtypeStruct((n_pad, T_pad), jnp.float32),
            grid_spec=pltpu.PrefetchScalarGridSpec(
                num_scalar_prefetch=0,
                grid=grid,
                in_specs=in_specs,
                out_specs=out_specs,
                scratch_shapes=[pltpu.VMEM((n_tile, D), jnp.float32),   # logits
                                pltpu.VMEM((n_tile, O), jnp.float32)]), # answer acc
            compiler_params=pltpu.CompilerParams(
                dimension_semantics=("parallel", "arbitrary"),
                vmem_limit_bytes=meta["vmem_limit"]),
        )(x,
          arrays["w_rd"], arrays["b_rd"], arrays["w_rd1"], arrays["b_rd1"],
          arrays["bik"], arrays["s_sum"], arrays["w_bias"], arrays["blb"],
          arrays["w_cls"], arrays["b_cls"], arrays["prelu"])

    try:
        out = run(single_buffer_weights=True)
    except Exception:
        # pl.Buffered(1) single-buffering not supported on this jax build;
        # fall back to default double-buffered weight specs (correct, more VMEM).
        out = run(single_buffer_weights=False)

    return out[:N, :T].reshape(B, S, T)


# --------------------------------------------------------------------------
# Parameters & references
# --------------------------------------------------------------------------
def make_params(key, hidden_size, biaffine_size, n_tags):
    D, O, T = hidden_size, biaffine_size, n_tags
    ks = jax.random.split(key, 4)

    def xavier_normal(k, fan_in, fan_out, shape):
        std = (2.0 / (fan_in + fan_out)) ** 0.5
        return std * jax.random.normal(k, shape, dtype=jnp.float32)

    # Linear weights stored as (in, out) = PyTorch weight transposed.
    return {
        "w_rd":  xavier_normal(ks[0], D, D, (D, D)),
        "b_rd":  jnp.full((D,), 0.01, jnp.float32),
        "w_rd1": xavier_normal(ks[1], D, D, (D, D)),
        "b_rd1": jnp.full((D,), 0.01, jnp.float32),
        # BiaffineLayer: only `kernel` is xavier-initialized; first/second bias
        # start at zero; label_bias = 0.01.
        "bi_kernel":      xavier_normal(ks[2], D, D * O, (D, D * O)),
        "bi_first_bias":  jnp.zeros((D, O), jnp.float32),
        "bi_second_bias": jnp.zeros((D, O), jnp.float32),
        "bi_label_bias":  jnp.full((O,), 0.01, jnp.float32),
        "w_cls": xavier_normal(ks[3], T, O, (O, T)),
        "b_cls": jnp.full((T,), 0.01, jnp.float32),
        "prelu_a":  jnp.array(0.25, jnp.float32),   # torch.nn.PReLU default
        "prelu1_a": jnp.array(0.25, jnp.float32),
    }


def _bf16_round(x):
    """Round-to-nearest-even onto the bf16 grid, kept in f32.  Unlike
    x.astype(bf16).astype(f32), XLA cannot elide this under excess-precision
    optimizations, so it faithfully mirrors the kernel's bf16 casts."""
    return jax.lax.reduce_precision(x, exponent_bits=8, mantissa_bits=7)


def ner_head_matched_reference(hidden, params, mxu_dtype=MXU_DTYPE):
    """Pure-JAX mirror of the kernel's arithmetic (same bf16 casts at every
    matmul input and at the biaffine elementwise product) for a tight check."""
    B, S, D = hidden.shape
    O = params["bi_label_bias"].shape[-1]
    f32 = jnp.float32

    def mm(a, b):
        return jnp.dot(a.astype(mxu_dtype), b.astype(mxu_dtype),
                       preferred_element_type=f32)

    a0, a1 = params["prelu_a"], params["prelu1_a"]
    x = _bf16_round(hidden.reshape(-1, D).astype(f32))   # bf16-streamed x
    h = jnp.where(x > 0, x, a0 * x)
    logits = mm(h, params["w_rd"]) + params["b_rd"]
    logits = logits + (mm(logits, params["w_rd1"]) + params["b_rd1"])

    kern_om = (params["bi_kernel"].reshape(D, D, O)
               .transpose(0, 2, 1).reshape(D, O * D))
    first = mm(x, kern_om)                                 # (N, O*D) f32
    lrep = jnp.tile(_bf16_round(logits), (1, O))           # (N, O*D), o-major
    prod = _bf16_round(_bf16_round(first) * lrep)          # kernel's bf16 product
    answer = prod.reshape(-1, O, D).sum(axis=-1)           # (N, O)

    w_bias = jnp.concatenate([params["bi_first_bias"],
                              params["bi_second_bias"]], axis=0)
    answer = answer + mm(jnp.concatenate([x, logits], axis=1), w_bias)
    answer = answer + params["bi_label_bias"]

    h2 = jnp.where(answer > 0, answer, a1 * answer)
    out = mm(h2, params["w_cls"]) + params["b_cls"]
    return out.reshape(B, S, -1)


def ner_head_reference(hidden, params):
    """Exact f32 reference mirroring the PyTorch forward (post-BERT)."""
    B, S, D = hidden.shape
    O = params["bi_label_bias"].shape[-1]
    hp = jax.lax.Precision.HIGHEST
    x = hidden.reshape(-1, D).astype(jnp.float32)
    a0, a1 = params["prelu_a"], params["prelu1_a"]

    h = jnp.where(x > 0, x, a0 * x)
    logits = jnp.dot(h, params["w_rd"], precision=hp) + params["b_rd"]
    logits = logits + (jnp.dot(logits, params["w_rd1"], precision=hp)
                       + params["b_rd1"])

    first = jnp.dot(x, params["bi_kernel"], precision=hp).reshape(-1, D, O)
    answer = jnp.einsum("bdh,bd->bh", first, logits, precision=hp)
    answer = answer + jnp.dot(x, params["bi_first_bias"], precision=hp)
    answer = answer + jnp.dot(logits, params["bi_second_bias"], precision=hp)
    answer = answer + params["bi_label_bias"]

    h2 = jnp.where(answer > 0, answer, a1 * answer)
    out = jnp.dot(h2, params["w_cls"], precision=hp) + params["b_cls"]
    return out.reshape(B, S, -1)


if __name__ == "__main__":
    B, S = 2, 8           # batch, sequence length
    D = 32                # hidden_size (small stand-in for 768)
    O = 16                # biaffine_size
    T = 8                 # n_tags

    key = jax.random.PRNGKey(0)
    k_param, k_hidden, k_b1, k_b2 = jax.random.split(key, 4)
    params = make_params(k_param, D, O, T)
    # PyTorch init leaves the biaffine first/second biases at zero; perturb
    # them here so those matmul paths are actually exercised by the check.
    params["bi_first_bias"] = 0.02 * jax.random.normal(k_b1, (D, O), jnp.float32)
    params["bi_second_bias"] = 0.02 * jax.random.normal(k_b2, (D, O), jnp.float32)

    # Synthetic deterministic stand-in for self.bert(input_ids, mask)[0].
    hidden = jax.random.normal(k_hidden, (B, S, D), dtype=jnp.float32)

    arrays, meta = prepare_params(params)
    out = ner_head(hidden, arrays, meta)
    out = jax.block_until_ready(out)
    assert out.shape == (B, S, T), out.shape

    # Tight check: reference mirroring the kernel's bf16 casts exactly.
    ref_matched = ner_head_matched_reference(hidden, params)
    # Sanity check: exact-f32 reference (bound sized for bf16 matmul inputs).
    ref_f32 = ner_head_reference(hidden, params)

    scale = float(jnp.max(jnp.abs(ref_f32)))
    err_matched = float(jnp.max(jnp.abs(out - ref_matched)))
    err_f32 = float(jnp.max(jnp.abs(out - ref_f32)))
    assert err_matched <= 1e-3 + 1e-3 * scale, ("matched", err_matched, scale)
    assert err_f32 <= 5e-2 + 5e-2 * scale, ("f32", err_f32, scale)

    print("KERNEL_OK")
</pallas_src>

<mosaic_0001>
module attributes {stable_mosaic.version = 11 : i64} {
  func.func @_ner_head_kernel(%arg0: i32, %arg1: i32, %arg2: memref<8x32xbf16, #tpu.memory_space<vmem>>, %arg3: memref<32x32xbf16, #tpu.memory_space<vmem>>, %arg4: memref<1x32xf32, #tpu.memory_space<vmem>>, %arg5: memref<32x32xbf16, #tpu.memory_space<vmem>>, %arg6: memref<1x32xf32, #tpu.memory_space<vmem>>, %arg7: memref<1x32x512xbf16, #tpu.memory_space<vmem>>, %arg8: memref<1x512x16xbf16, #tpu.memory_space<vmem>>, %arg9: memref<64x16xbf16, #tpu.memory_space<vmem>>, %arg10: memref<1x16xf32, #tpu.memory_space<vmem>>, %arg11: memref<16x128xbf16, #tpu.memory_space<vmem>>, %arg12: memref<1x128xf32, #tpu.memory_space<vmem>>, %arg13: memref<2xf32, #tpu.memory_space<smem>>, %arg14: memref<8x128xf32, #tpu.memory_space<vmem>>, %arg15: memref<8x32xf32, #tpu.memory_space<vmem>>, %arg16: memref<8x16xf32, #tpu.memory_space<vmem>>) attributes {dimension_semantics = [#tpu.dimension_semantics<parallel>, #tpu.dimension_semantics<arbitrary>], iteration_bounds = array<i64: 2, 1>, scalar_prefetch = 0 : i64, scratch_operands = 2 : i64, tpu.core_type = #tpu.core_type<tc>, window_params = [{transform_indices = @transform_0, window_bounds = array<i64: 8, 32>}, {pipeline_mode = #tpu.pipeline_mode<synchronous>, transform_indices = @transform_1, window_bounds = array<i64: 32, 32>}, {pipeline_mode = #tpu.pipeline_mode<synchronous>, transform_indices = @transform_2, window_bounds = array<i64: 1, 32>}, {pipeline_mode = #tpu.pipeline_mode<synchronous>, transform_indices = @transform_3, window_bounds = array<i64: 32, 32>}, {pipeline_mode = #tpu.pipeline_mode<synchronous>, transform_indices = @transform_4, window_bounds = array<i64: 1, 32>}, {pipeline_mode = #tpu.pipeline_mode<synchronous>, transform_indices = @transform_5, window_bounds = array<i64: 1, 32, 512>}, {pipeline_mode = #tpu.pipeline_mode<synchronous>, transform_indices = @transform_6, window_bounds = array<i64: 1, 512, 16>}, {pipeline_mode = #tpu.pipeline_mode<synchronous>, transform_indices = @transform_7, window_bounds = array<i64: 64, 16>}, {pipeline_mode = #tpu.pipeline_mode<synchronous>, transform_indices = @transform_8, window_bounds = array<i64: 1, 16>}, {pipeline_mode = #tpu.pipeline_mode<synchronous>, transform_indices = @transform_9, window_bounds = array<i64: 16, 128>}, {pipeline_mode = #tpu.pipeline_mode<synchronous>, transform_indices = @transform_10, window_bounds = array<i64: 1, 128>}, {transform_indices = @transform_11, window_bounds = array<i64: 2>}, {transform_indices = @transform_12, window_bounds = array<i64: 8, 128>}]} {
    %c0 = arith.constant 0 : index
    %0 = memref.load %arg13[%c0] : memref<2xf32, #tpu.memory_space<smem>>
    %c1 = arith.constant 1 : index
    %1 = memref.load %arg13[%c1] : memref<2xf32, #tpu.memory_space<smem>>
    %c0_0 = arith.constant 0 : index
    %c0_1 = arith.constant 0 : index
    %2 = vector.load %arg2[%c0_0, %c0_1] : memref<8x32xbf16, #tpu.memory_space<vmem>>, vector<8x32xbf16>
    %3 = arith.extf %2 : vector<8x32xbf16> to vector<8x32xf32>
    %cst = arith.constant 0.000000e+00 : f32
    %4 = vector.broadcast %cst : f32 to vector<8x32xf32>
    %5 = arith.cmpf ogt, %3, %4 : vector<8x32xf32>
    %6 = vector.broadcast %0 : f32 to vector<8x32xf32>
    %7 = arith.mulf %6, %3 : vector<8x32xf32>
    %8 = arith.select %5, %3, %7 : vector<8x32xi1>, vector<8x32xf32>
    %9 = arith.truncf %8 : vector<8x32xf32> to vector<8x32xbf16>
    %c0_2 = arith.constant 0 : index
    %c0_3 = arith.constant 0 : index
    %10 = vector.load %arg3[%c0_2, %c0_3] : memref<32x32xbf16, #tpu.memory_space<vmem>>, vector<32x32xbf16>
    %cst_4 = arith.constant dense<0.000000e+00> : vector<8x32xf32>
    %11 = tpu.matmul %9, %10, %cst_4 {dimension_numbers = #tpu.dot_dimension_numbers<[1], [0], [0], [1], [0, 0, 1, 1], [], []>} : vector<8x32xbf16>, vector<32x32xbf16>, vector<8x32xf32> -> vector<8x32xf32>
    %c0_5 = arith.constant 0 : index
    %c0_6 = arith.constant 0 : index
    %12 = vector.load %arg4[%c0_5, %c0_6] : memref<1x32xf32, #tpu.memory_space<vmem>>, vector<1x32xf32>
    %13 = vector.broadcast %12 : vector<1x32xf32> to vector<8x32xf32>
    %14 = arith.addf %11, %13 : vector<8x32xf32>
    %15 = arith.truncf %14 : vector<8x32xf32> to vector<8x32xbf16>
    %c0_7 = arith.constant 0 : index
    %c0_8 = arith.constant 0 : index
    %16 = vector.load %arg5[%c0_7, %c0_8] : memref<32x32xbf16, #tpu.memory_space<vmem>>, vector<32x32xbf16>
    %cst_9 = arith.constant dense<0.000000e+00> : vector<8x32xf32>
    %17 = tpu.matmul %15, %16, %cst_9 {dimension_numbers = #tpu.dot_dimension_numbers<[1], [0], [0], [1], [0, 0, 1, 1], [], []>} : vector<8x32xbf16>, vector<32x32xbf16>, vector<8x32xf32> -> vector<8x32xf32>
    %c0_10 = arith.constant 0 : index
    %c0_11 = arith.constant 0 : index
    %18 = vector.load %arg6[%c0_10, %c0_11] : memref<1x32xf32, #tpu.memory_space<vmem>>, vector<1x32xf32>
    %19 = vector.broadcast %18 : vector<1x32xf32> to vector<8x32xf32>
    %20 = arith.addf %17, %19 : vector<8x32xf32>
    %21 = arith.addf %14, %20 : vector<8x32xf32>
    %c0_12 = arith.constant 0 : index
    %c0_13 = arith.constant 0 : index
    %22 = vector.load %arg15[%c0_12, %c0_13] : memref<8x32xf32, #tpu.memory_space<vmem>>, vector<8x32xf32>
    tpu.vector_store %arg15[%c0_12, %c0_13], %21 {strides = array<i32>} : memref<8x32xf32, #tpu.memory_space<vmem>>, vector<8x32xf32>,
    %23 = arith.truncf %21 : vector<8x32xf32> to vector<8x32xbf16>
    %24 = tpu.concatenate %2, %23 in 1 : vector<8x32xbf16>, vector<8x32xbf16> -> vector<8x64xbf16>
    %c0_14 = arith.constant 0 : index
    %c0_15 = arith.constant 0 : index
    %25 = vector.load %arg9[%c0_14, %c0_15] : memref<64x16xbf16, #tpu.memory_space<vmem>>, vector<64x16xbf16>
    %cst_16 = arith.constant dense<0.000000e+00> : vector<8x16xf32>
    %26 = tpu.matmul %24, %25, %cst_16 {dimension_numbers = #tpu.dot_dimension_numbers<[1], [0], [0], [1], [0, 0, 1, 1], [], []>} : vector<8x64xbf16>, vector<64x16xbf16>, vector<8x16xf32> -> vector<8x16xf32>
    %c0_17 = arith.constant 0 : index
    %c0_18 = arith.constant 0 : index
    %27 = vector.load %arg10[%c0_17, %c0_18] : memref<1x16xf32, #tpu.memory_space<vmem>>, vector<1x16xf32>
    %28 = vector.broadcast %27 : vector<1x16xf32> to vector<8x16xf32>
    %29 = arith.addf %26, %28 : vector<8x16xf32>
    %c0_19 = arith.constant 0 : index
    %c0_20 = arith.constant 0 : index
    %30 = vector.load %arg16[%c0_19, %c0_20] : memref<8x16xf32, #tpu.memory_space<vmem>>, vector<8x16xf32>
    tpu.vector_store %arg16[%c0_19, %c0_20], %29 {strides = array<i32>} : memref<8x16xf32, #tpu.memory_space<vmem>>, vector<8x16xf32>,
    %c0_21 = arith.constant 0 : index
    %c0_22 = arith.constant 0 : index
    %31 = vector.load %arg15[%c0_21, %c0_22] : memref<8x32xf32, #tpu.memory_space<vmem>>, vector<8x32xf32>
    %32 = arith.truncf %31 : vector<8x32xf32> to vector<8x32xbf16>
    %33 = tpu.concatenate %32, %32, %32, %32, %32, %32, %32, %32, %32, %32, %32, %32, %32, %32, %32, %32 in 1 : vector<8x32xbf16>, vector<8x32xbf16>, vector<8x32xbf16>, vector<8x32xbf16>, vector<8x32xbf16>, vector<8x32xbf16>, vector<8x32xbf16>, vector<8x32xbf16>, vector<8x32xbf16>, vector<8x32xbf16>, vector<8x32xbf16>, vector<8x32xbf16>, vector<8x32xbf16>, vector<8x32xbf16>, vector<8x32xbf16>, vector<8x32xbf16> -> vector<8x512xbf16>
    %c0_23 = arith.constant 0 : index
    %c0_24 = arith.constant 0 : index
    %c0_25 = arith.constant 0 : index
    %34 = vector.load %arg7[%c0_23, %c0_24, %c0_25] : memref<1x32x512xbf16, #tpu.memory_space<vmem>>, vector<1x32x512xbf16>
    %35 = vector.shape_cast %34 : vector<1x32x512xbf16> to vector<32x512xbf16>
    %cst_26 = arith.constant dense<0.000000e+00> : vector<8x512xf32>
    %36 = tpu.matmul %2, %35, %cst_26 {dimension_numbers = #tpu.dot_dimension_numbers<[1], [0], [0], [1], [0, 0, 1, 1], [], []>} : vector<8x32xbf16>, vector<32x512xbf16>, vector<8x512xf32> -> vector<8x512xf32>
    %37 = arith.truncf %36 : vector<8x512xf32> to vector<8x512xbf16>
    %38 = arith.mulf %37, %33 : vector<8x512xbf16>
    %c0_27 = arith.constant 0 : index
    %c0_28 = arith.constant 0 : index
    %39 = vector.load %arg16[%c0_27, %c0_28] : memref<8x16xf32, #tpu.memory_space<vmem>>, vector<8x16xf32>
    %c0_29 = arith.constant 0 : index
    %c0_30 = arith.constant 0 : index
    %c0_31 = arith.constant 0 : index
    %40 = vector.load %arg8[%c0_29, %c0_30, %c0_31] : memref<1x512x16xbf16, #tpu.memory_space<vmem>>, vector<1x512x16xbf16>
    %41 = vector.shape_cast %40 : vector<1x512x16xbf16> to vector<512x16xbf16>
    %cst_32 = arith.constant dense<0.000000e+00> : vector<8x16xf32>
    %42 = tpu.matmul %38, %41, %cst_32 {dimension_numbers = #tpu.dot_dimension_numbers<[1], [0], [0], [1], [0, 0, 1, 1], [], []>} : vector<8x512xbf16>, vector<512x16xbf16>, vector<8x16xf32> -> vector<8x16xf32>
    %43 = arith.addf %39, %42 : vector<8x16xf32>
    %c0_33 = arith.constant 0 : index
    %c0_34 = arith.constant 0 : index
    %44 = vector.load %arg16[%c0_33, %c0_34] : memref<8x16xf32, #tpu.memory_space<vmem>>, vector<8x16xf32>
    tpu.vector_store %arg16[%c0_33, %c0_34], %43 {strides = array<i32>} : memref<8x16xf32, #tpu.memory_space<vmem>>, vector<8x16xf32>,
    %c0_35 = arith.constant 0 : index
    %c0_36 = arith.constant 0 : index
    %45 = vector.load %arg16[%c0_35, %c0_36] : memref<8x16xf32, #tpu.memory_space<vmem>>, vector<8x16xf32>
    %cst_37 = arith.constant 0.000000e+00 : f32
    %46 = vector.broadcast %cst_37 : f32 to vector<8x16xf32>
    %47 = arith.cmpf ogt, %45, %46 : vector<8x16xf32>
    %48 = vector.broadcast %1 : f32 to vector<8x16xf32>
    %49 = arith.mulf %48, %45 : vector<8x16xf32>
    %50 = arith.select %47, %45, %49 : vector<8x16xi1>, vector<8x16xf32>
    %51 = arith.truncf %50 : vector<8x16xf32> to vector<8x16xbf16>
    %c0_38 = arith.constant 0 : index
    %c0_39 = arith.constant 0 : index
    %52 = vector.load %arg11[%c0_38, %c0_39] : memref<16x128xbf16, #tpu.memory_space<vmem>>, vector<16x128xbf16>
    %cst_40 = arith.constant dense<0.000000e+00> : vector<8x128xf32>
    %53 = tpu.matmul %51, %52, %cst_40 {dimension_numbers = #tpu.dot_dimension_numbers<[1], [0], [0], [1], [0, 0, 1, 1], [], []>} : vector<8x16xbf16>, vector<16x128xbf16>, vector<8x128xf32> -> vector<8x128xf32>
    %c0_41 = arith.constant 0 : index
    %c0_42 = arith.constant 0 : index
    %54 = vector.load %arg12[%c0_41, %c0_42] : memref<1x128xf32, #tpu.memory_space<vmem>>, vector<1x128xf32>
    %55 = vector.broadcast %54 : vector<1x128xf32> to vector<8x128xf32>
    %56 = arith.addf %53, %55 : vector<8x128xf32>
    %c0_43 = arith.constant 0 : index
    %c0_44 = arith.constant 0 : index
    %57 = vector.load %arg14[%c0_43, %c0_44] : memref<8x128xf32, #tpu.memory_space<vmem>>, vector<8x128xf32>
    tpu.vector_store %arg14[%c0_43, %c0_44], %56 {strides = array<i32>} : memref<8x128xf32, #tpu.memory_space<vmem>>, vector<8x128xf32>,
    return
  }
  func.func @transform_0(%arg0: i32, %arg1: i32) -> (i32, i32) {
    %c0_i32 = arith.constant 0 : i32
    %c0_i32_0 = arith.constant 0 : i32
    return %arg0, %c0_i32 : i32, i32
  }
  func.func @transform_1(%arg0: i32, %arg1: i32) -> (i32, i32) {
    %c0_i32 = arith.constant 0 : i32
    %c0_i32_0 = arith.constant 0 : i32
    %c0_i32_1 = arith.constant 0 : i32
    return %c0_i32, %c0_i32_0 : i32, i32
  }
  func.func @transform_2(%arg0: i32, %arg1: i32) -> (i32, i32) {
    %c0_i32 = arith.constant 0 : i32
    %c0_i32_0 = arith.constant 0 : i32
    %c0_i32_1 = arith.constant 0 : i32
    return %c0_i32, %c0_i32_0 : i32, i32
  }
  func.func @transform_3(%arg0: i32, %arg1: i32) -> (i32, i32) {
    %c0_i32 = arith.constant 0 : i32
    %c0_i32_0 = arith.constant 0 : i32
    %c0_i32_1 = arith.constant 0 : i32
    return %c0_i32, %c0_i32_0 : i32, i32
  }
  func.func @transform_4(%arg0: i32, %arg1: i32) -> (i32, i32) {
    %c0_i32 = arith.constant 0 : i32
    %c0_i32_0 = arith.constant 0 : i32
    %c0_i32_1 = arith.constant 0 : i32
    return %c0_i32, %c0_i32_0 : i32, i32
  }
  func.func @transform_5(%arg0: i32, %arg1: i32) -> (i32, i32, i32) {
    %c0_i32 = arith.constant 0 : i32
    %c0_i32_0 = arith.constant 0 : i32
    %c0_i32_1 = arith.constant 0 : i32
    %c0_i32_2 = arith.constant 0 : i32
    return %c0_i32, %c0_i32_0, %c0_i32_1 : i32, i32, i32
  }
  func.func @transform_6(%arg0: i32, %arg1: i32) -> (i32, i32, i32) {
    %c0_i32 = arith.constant 0 : i32
    %c0_i32_0 = arith.constant 0 : i32
    %c0_i32_1 = arith.constant 0 : i32
    %c0_i32_2 = arith.constant 0 : i32
    return %c0_i32, %c0_i32_0, %c0_i32_1 : i32, i32, i32
  }
  func.func @transform_7(%arg0: i32, %arg1: i32) -> (i32, i32) {
    %c0_i32 = arith.constant 0 : i32
    %c0_i32_0 = arith.constant 0 : i32
    %c0_i32_1 = arith.constant 0 : i32
    return %c0_i32, %c0_i32_0 : i32, i32
  }
  func.func @transform_8(%arg0: i32, %arg1: i32) -> (i32, i32) {
    %c0_i32 = arith.constant 0 : i32
    %c0_i32_0 = arith.constant 0 : i32
    %c0_i32_1 = arith.constant 0 : i32
    return %c0_i32, %c0_i32_0 : i32, i32
  }
  func.func @transform_9(%arg0: i32, %arg1: i32) -> (i32, i32) {
    %c0_i32 = arith.constant 0 : i32
    %c0_i32_0 = arith.constant 0 : i32
    %c0_i32_1 = arith.constant 0 : i32
    return %c0_i32, %c0_i32_0 : i32, i32
  }
  func.func @transform_10(%arg0: i32, %arg1: i32) -> (i32, i32) {
    %c0_i32 = arith.constant 0 : i32
    %c0_i32_0 = arith.constant 0 : i32
    %c0_i32_1 = arith.constant 0 : i32
    return %c0_i32, %c0_i32_0 : i32, i32
  }
  func.func @transform_11(%arg0: i32, %arg1: i32) -> i32 {
    %c0_i32 = arith.constant 0 : i32
    %c0_i32_0 = arith.constant 0 : i32
    return %c0_i32 : i32
  }
  func.func @transform_12(%arg0: i32, %arg1: i32) -> (i32, i32) {
    %c0_i32 = arith.constant 0 : i32
    %c0_i32_0 = arith.constant 0 : i32
    return %arg0, %c0_i32 : i32, i32
  }
}

module attributes {stable_mosaic.version = 11 : i64} {
  func.func @_ner_head_kernel(%arg0: i32, %arg1: i32, %arg2: memref<8x32xbf16, #tpu.memory_space<vmem>>, %arg3: memref<32x32xbf16, #tpu.memory_space<vmem>>, %arg4: memref<1x32xf32, #tpu.memory_space<vmem>>, %arg5: memref<32x32xbf16, #tpu.memory_space<vmem>>, %arg6: memref<1x32xf32, #tpu.memory_space<vmem>>, %arg7: memref<1x32x512xbf16, #tpu.memory_space<vmem>>, %arg8: memref<1x512x16xbf16, #tpu.memory_space<vmem>>, %arg9: memref<64x16xbf16, #tpu.memory_space<vmem>>, %arg10: memref<1x16xf32, #tpu.memory_space<vmem>>, %arg11: memref<16x128xbf16, #tpu.memory_space<vmem>>, %arg12: memref<1x128xf32, #tpu.memory_space<vmem>>, %arg13: memref<2xf32, #tpu.memory_space<smem>>, %arg14: memref<8x128xf32, #tpu.memory_space<vmem>>, %arg15: memref<8x32xf32, #tpu.memory_space<vmem>>, %arg16: memref<8x16xf32, #tpu.memory_space<vmem>>) attributes {dimension_semantics = [#tpu.dimension_semantics<parallel>, #tpu.dimension_semantics<arbitrary>], iteration_bounds = array<i64: 2, 1>, scalar_prefetch = 0 : i64, scratch_operands = 2 : i64, tpu.core_type = #tpu.core_type<tc>, window_params = [{transform_indices = @transform_0, window_bounds = array<i64: 8, 32>}, {pipeline_mode = #tpu.pipeline_mode<synchronous>, transform_indices = @transform_1, window_bounds = array<i64: 32, 32>}, {pipeline_mode = #tpu.pipeline_mode<synchronous>, transform_indices = @transform_2, window_bounds = array<i64: 1, 32>}, {pipeline_mode = #tpu.pipeline_mode<synchronous>, transform_indices = @transform_3, window_bounds = array<i64: 32, 32>}, {pipeline_mode = #tpu.pipeline_mode<synchronous>, transform_indices = @transform_4, window_bounds = array<i64: 1, 32>}, {pipeline_mode = #tpu.pipeline_mode<synchronous>, transform_indices = @transform_5, window_bounds = array<i64: 1, 32, 512>}, {pipeline_mode = #tpu.pipeline_mode<synchronous>, transform_indices = @transform_6, window_bounds = array<i64: 1, 512, 16>}, {pipeline_mode = #tpu.pipeline_mode<synchronous>, transform_indices = @transform_7, window_bounds = array<i64: 64, 16>}, {pipeline_mode = #tpu.pipeline_mode<synchronous>, transform_indices = @transform_8, window_bounds = array<i64: 1, 16>}, {pipeline_mode = #tpu.pipeline_mode<synchronous>, transform_indices = @transform_9, window_bounds = array<i64: 16, 128>}, {pipeline_mode = #tpu.pipeline_mode<synchronous>, transform_indices = @transform_10, window_bounds = array<i64: 1, 128>}, {transform_indices = @transform_11, window_bounds = array<i64: 2>}, {transform_indices = @transform_12, window_bounds = array<i64: 8, 128>}]} {
    %c0 = arith.constant 0 : index
    %0 = memref.load %arg13[%c0] : memref<2xf32, #tpu.memory_space<smem>>
    %c1 = arith.constant 1 : index
    %1 = memref.load %arg13[%c1] : memref<2xf32, #tpu.memory_space<smem>>
    %c0_0 = arith.constant 0 : index
    %c0_1 = arith.constant 0 : index
    %2 = vector.load %arg2[%c0_0, %c0_1] : memref<8x32xbf16, #tpu.memory_space<vmem>>, vector<8x32xbf16>
    %3 = arith.extf %2 : vector<8x32xbf16> to vector<8x32xf32>
    %cst = arith.constant 0.000000e+00 : f32
    %4 = vector.broadcast %cst : f32 to vector<8x32xf32>
    %5 = arith.cmpf ogt, %3, %4 : vector<8x32xf32>
    %6 = vector.broadcast %0 : f32 to vector<8x32xf32>
    %7 = arith.mulf %6, %3 : vector<8x32xf32>
    %8 = arith.select %5, %3, %7 : vector<8x32xi1>, vector<8x32xf32>
    %9 = arith.truncf %8 : vector<8x32xf32> to vector<8x32xbf16>
    %c0_2 = arith.constant 0 : index
    %c0_3 = arith.constant 0 : index
    %10 = vector.load %arg3[%c0_2, %c0_3] : memref<32x32xbf16, #tpu.memory_space<vmem>>, vector<32x32xbf16>
    %cst_4 = arith.constant dense<0.000000e+00> : vector<8x32xf32>
    %11 = tpu.matmul %9, %10, %cst_4 {dimension_numbers = #tpu.dot_dimension_numbers<[1], [0], [0], [1], [0, 0, 1, 1], [], []>} : vector<8x32xbf16>, vector<32x32xbf16>, vector<8x32xf32> -> vector<8x32xf32>
    %c0_5 = arith.constant 0 : index
    %c0_6 = arith.constant 0 : index
    %12 = vector.load %arg4[%c0_5, %c0_6] : memref<1x32xf32, #tpu.memory_space<vmem>>, vector<1x32xf32>
    %13 = vector.broadcast %12 : vector<1x32xf32> to vector<8x32xf32>
    %14 = arith.addf %11, %13 : vector<8x32xf32>
    %15 = arith.truncf %14 : vector<8x32xf32> to vector<8x32xbf16>
    %c0_7 = arith.constant 0 : index
    %c0_8 = arith.constant 0 : index
    %16 = vector.load %arg5[%c0_7, %c0_8] : memref<32x32xbf16, #tpu.memory_space<vmem>>, vector<32x32xbf16>
    %cst_9 = arith.constant dense<0.000000e+00> : vector<8x32xf32>
    %17 = tpu.matmul %15, %16, %cst_9 {dimension_numbers = #tpu.dot_dimension_numbers<[1], [0], [0], [1], [0, 0, 1, 1], [], []>} : vector<8x32xbf16>, vector<32x32xbf16>, vector<8x32xf32> -> vector<8x32xf32>
    %c0_10 = arith.constant 0 : index
    %c0_11 = arith.constant 0 : index
    %18 = vector.load %arg6[%c0_10, %c0_11] : memref<1x32xf32, #tpu.memory_space<vmem>>, vector<1x32xf32>
    %19 = vector.broadcast %18 : vector<1x32xf32> to vector<8x32xf32>
    %20 = arith.addf %17, %19 : vector<8x32xf32>
    %21 = arith.addf %14, %20 : vector<8x32xf32>
    %c0_12 = arith.constant 0 : index
    %c0_13 = arith.constant 0 : index
    %22 = vector.load %arg15[%c0_12, %c0_13] : memref<8x32xf32, #tpu.memory_space<vmem>>, vector<8x32xf32>
    tpu.vector_store %arg15[%c0_12, %c0_13], %21 {strides = array<i32>} : memref<8x32xf32, #tpu.memory_space<vmem>>, vector<8x32xf32>,
    %23 = arith.truncf %21 : vector<8x32xf32> to vector<8x32xbf16>
    %24 = tpu.concatenate %2, %23 in 1 : vector<8x32xbf16>, vector<8x32xbf16> -> vector<8x64xbf16>
    %c0_14 = arith.constant 0 : index
    %c0_15 = arith.constant 0 : index
    %25 = vector.load %arg9[%c0_14, %c0_15] : memref<64x16xbf16, #tpu.memory_space<vmem>>, vector<64x16xbf16>
    %cst_16 = arith.constant dense<0.000000e+00> : vector<8x16xf32>
    %26 = tpu.matmul %24, %25, %cst_16 {dimension_numbers = #tpu.dot_dimension_numbers<[1], [0], [0], [1], [0, 0, 1, 1], [], []>} : vector<8x64xbf16>, vector<64x16xbf16>, vector<8x16xf32> -> vector<8x16xf32>
    %c0_17 = arith.constant 0 : index
    %c0_18 = arith.constant 0 : index
    %27 = vector.load %arg10[%c0_17, %c0_18] : memref<1x16xf32, #tpu.memory_space<vmem>>, vector<1x16xf32>
    %28 = vector.broadcast %27 : vector<1x16xf32> to vector<8x16xf32>
    %29 = arith.addf %26, %28 : vector<8x16xf32>
    %c0_19 = arith.constant 0 : index
    %c0_20 = arith.constant 0 : index
    %30 = vector.load %arg16[%c0_19, %c0_20] : memref<8x16xf32, #tpu.memory_space<vmem>>, vector<8x16xf32>
    tpu.vector_store %arg16[%c0_19, %c0_20], %29 {strides = array<i32>} : memref<8x16xf32, #tpu.memory_space<vmem>>, vector<8x16xf32>,
    %c0_21 = arith.constant 0 : index
    %c0_22 = arith.constant 0 : index
    %31 = vector.load %arg15[%c0_21, %c0_22] : memref<8x32xf32, #tpu.memory_space<vmem>>, vector<8x32xf32>
    %32 = arith.truncf %31 : vector<8x32xf32> to vector<8x32xbf16>
    %33 = tpu.concatenate %32, %32, %32, %32, %32, %32, %32, %32, %32, %32, %32, %32, %32, %32, %32, %32 in 1 : vector<8x32xbf16>, vector<8x32xbf16>, vector<8x32xbf16>, vector<8x32xbf16>, vector<8x32xbf16>, vector<8x32xbf16>, vector<8x32xbf16>, vector<8x32xbf16>, vector<8x32xbf16>, vector<8x32xbf16>, vector<8x32xbf16>, vector<8x32xbf16>, vector<8x32xbf16>, vector<8x32xbf16>, vector<8x32xbf16>, vector<8x32xbf16> -> vector<8x512xbf16>
    %c0_23 = arith.constant 0 : index
    %c0_24 = arith.constant 0 : index
    %c0_25 = arith.constant 0 : index
    %34 = vector.load %arg7[%c0_23, %c0_24, %c0_25] : memref<1x32x512xbf16, #tpu.memory_space<vmem>>, vector<1x32x512xbf16>
    %35 = vector.shape_cast %34 : vector<1x32x512xbf16> to vector<32x512xbf16>
    %cst_26 = arith.constant dense<0.000000e+00> : vector<8x512xf32>
    %36 = tpu.matmul %2, %35, %cst_26 {dimension_numbers = #tpu.dot_dimension_numbers<[1], [0], [0], [1], [0, 0, 1, 1], [], []>} : vector<8x32xbf16>, vector<32x512xbf16>, vector<8x512xf32> -> vector<8x512xf32>
    %37 = arith.truncf %36 : vector<8x512xf32> to vector<8x512xbf16>
    %38 = arith.mulf %37, %33 : vector<8x512xbf16>
    %c0_27 = arith.constant 0 : index
    %c0_28 = arith.constant 0 : index
    %39 = vector.load %arg16[%c0_27, %c0_28] : memref<8x16xf32, #tpu.memory_space<vmem>>, vector<8x16xf32>
    %c0_29 = arith.constant 0 : index
    %c0_30 = arith.constant 0 : index
    %c0_31 = arith.constant 0 : index
    %40 = vector.load %arg8[%c0_29, %c0_30, %c0_31] : memref<1x512x16xbf16, #tpu.memory_space<vmem>>, vector<1x512x16xbf16>
    %41 = vector.shape_cast %40 : vector<1x512x16xbf16> to vector<512x16xbf16>
    %cst_32 = arith.constant dense<0.000000e+00> : vector<8x16xf32>
    %42 = tpu.matmul %38, %41, %cst_32 {dimension_numbers = #tpu.dot_dimension_numbers<[1], [0], [0], [1], [0, 0, 1, 1], [], []>} : vector<8x512xbf16>, vector<512x16xbf16>, vector<8x16xf32> -> vector<8x16xf32>
    %43 = arith.addf %39, %42 : vector<8x16xf32>
    %c0_33 = arith.constant 0 : index
    %c0_34 = arith.constant 0 : index
    %44 = vector.load %arg16[%c0_33, %c0_34] : memref<8x16xf32, #tpu.memory_space<vmem>>, vector<8x16xf32>
    tpu.vector_store %arg16[%c0_33, %c0_34], %43 {strides = array<i32>} : memref<8x16xf32, #tpu.memory_space<vmem>>, vector<8x16xf32>,
    %c0_35 = arith.constant 0 : index
    %c0_36 = arith.constant 0 : index
    %45 = vector.load %arg16[%c0_35, %c0_36] : memref<8x16xf32, #tpu.memory_space<vmem>>, vector<8x16xf32>
    %cst_37 = arith.constant 0.000000e+00 : f32
    %46 = vector.broadcast %cst_37 : f32 to vector<8x16xf32>
    %47 = arith.cmpf ogt, %45, %46 : vector<8x16xf32>
    %48 = vector.broadcast %1 : f32 to vector<8x16xf32>
    %49 = arith.mulf %48, %45 : vector<8x16xf32>
    %50 = arith.select %47, %45, %49 : vector<8x16xi1>, vector<8x16xf32>
    %51 = arith.truncf %50 : vector<8x16xf32> to vector<8x16xbf16>
    %c0_38 = arith.constant 0 : index
    %c0_39 = arith.constant 0 : index
    %52 = vector.load %arg11[%c0_38, %c0_39] : memref<16x128xbf16, #tpu.memory_space<vmem>>, vector<16x128xbf16>
    %cst_40 = arith.constant dense<0.000000e+00> : vector<8x128xf32>
    %53 = tpu.matmul %51, %52, %cst_40 {dimension_numbers = #tpu.dot_dimension_numbers<[1], [0], [0], [1], [0, 0, 1, 1], [], []>} : vector<8x16xbf16>, vector<16x128xbf16>, vector<8x128xf32> -> vector<8x128xf32>
    %c0_41 = arith.constant 0 : index
    %c0_42 = arith.constant 0 : index
    %54 = vector.load %arg12[%c0_41, %c0_42] : memref<1x128xf32, #tpu.memory_space<vmem>>, vector<1x128xf32>
    %55 = vector.broadcast %54 : vector<1x128xf32> to vector<8x128xf32>
    %56 = arith.addf %53, %55 : vector<8x128xf32>
    %c0_43 = arith.constant 0 : index
    %c0_44 = arith.constant 0 : index
    %57 = vector.load %arg14[%c0_43, %c0_44] : memref<8x128xf32, #tpu.memory_space<vmem>>, vector<8x128xf32>
    tpu.vector_store %arg14[%c0_43, %c0_44], %56 {strides = array<i32>} : memref<8x128xf32, #tpu.memory_space<vmem>>, vector<8x128xf32>,
    return
  }
  func.func @transform_0(%arg0: i32, %arg1: i32) -> (i32, i32) {
    %c0_i32 = arith.constant 0 : i32
    %c0_i32_0 = arith.constant 0 : i32
    return %arg0, %c0_i32 : i32, i32
  }
  func.func @transform_1(%arg0: i32, %arg1: i32) -> (i32, i32) {
    %c0_i32 = arith.constant 0 : i32
    %c0_i32_0 = arith.constant 0 : i32
    %c0_i32_1 = arith.constant 0 : i32
    return %c0_i32, %c0_i32_0 : i32, i32
  }
  func.func @transform_2(%arg0: i32, %arg1: i32) -> (i32, i32) {
    %c0_i32 = arith.constant 0 : i32
    %c0_i32_0 = arith.constant 0 : i32
    %c0_i32_1 = arith.constant 0 : i32
    return %c0_i32, %c0_i32_0 : i32, i32
  }
  func.func @transform_3(%arg0: i32, %arg1: i32) -> (i32, i32) {
    %c0_i32 = arith.constant 0 : i32
    %c0_i32_0 = arith.constant 0 : i32
    %c0_i32_1 = arith.constant 0 : i32
    return %c0_i32, %c0_i32_0 : i32, i32
  }
  func.func @transform_4(%arg0: i32, %arg1: i32) -> (i32, i32) {
    %c0_i32 = arith.constant 0 : i32
    %c0_i32_0 = arith.constant 0 : i32
    %c0_i32_1 = arith.constant 0 : i32
    return %c0_i32, %c0_i32_0 : i32, i32
  }
  func.func @transform_5(%arg0: i32, %arg1: i32) -> (i32, i32, i32) {
    %c0_i32 = arith.constant 0 : i32
    %c0_i32_0 = arith.constant 0 : i32
    %c0_i32_1 = arith.constant 0 : i32
    %c0_i32_2 = arith.constant 0 : i32
    return %c0_i32, %c0_i32_0, %c0_i32_1 : i32, i32, i32
  }
  func.func @transform_6(%arg0: i32, %arg1: i32) -> (i32, i32, i32) {
    %c0_i32 = arith.constant 0 : i32
    %c0_i32_0 = arith.constant 0 : i32
    %c0_i32_1 = arith.constant 0 : i32
    %c0_i32_2 = arith.constant 0 : i32
    return %c0_i32, %c0_i32_0, %c0_i32_1 : i32, i32, i32
  }
  func.func @transform_7(%arg0: i32, %arg1: i32) -> (i32, i32) {
    %c0_i32 = arith.constant 0 : i32
    %c0_i32_0 = arith.constant 0 : i32
    %c0_i32_1 = arith.constant 0 : i32
    return %c0_i32, %c0_i32_0 : i32, i32
  }
  func.func @transform_8(%arg0: i32, %arg1: i32) -> (i32, i32) {
    %c0_i32 = arith.constant 0 : i32
    %c0_i32_0 = arith.constant 0 : i32
    %c0_i32_1 = arith.constant 0 : i32
    return %c0_i32, %c0_i32_0 : i32, i32
  }
  func.func @transform_9(%arg0: i32, %arg1: i32) -> (i32, i32) {
    %c0_i32 = arith.constant 0 : i32
    %c0_i32_0 = arith.constant 0 : i32
    %c0_i32_1 = arith.constant 0 : i32
    return %c0_i32, %c0_i32_0 : i32, i32
  }
  func.func @transform_10(%arg0: i32, %arg1: i32) -> (i32, i32) {
    %c0_i32 = arith.constant 0 : i32
    %c0_i32_0 = arith.constant 0 : i32
    %c0_i32_1 = arith.constant 0 : i32
    return %c0_i32, %c0_i32_0 : i32, i32
  }
  func.func @transform_11(%arg0: i32, %arg1: i32) -> i32 {
    %c0_i32 = arith.constant 0 : i32
    %c0_i32_0 = arith.constant 0 : i32
    return %c0_i32 : i32
  }
  func.func @transform_12(%arg0: i32, %arg1: i32) -> (i32, i32) {
    %c0_i32 = arith.constant 0 : i32
    %c0_i32_0 = arith.constant 0 : i32
    return %arg0, %c0_i32 : i32, i32
  }
}

</mosaic_0001>

<bundles_post_ra>
// kernel: tpu_custom_call.1
= control target key start
LH: loop header
LB: loop body
LE: loop exit
PB: predicated region body
PF: predicated region fallthrough
CT: control target
= control target key end

     0   :  { %s2118_s0 = inlined_call_operand.vmem [shape: bf16[16,32], index: 0, kind: input, shape index: {}]   ;;  %s2119_s1 = inlined_call_operand.vmem [shape: bf16[32,32], index: 1, kind: input, shape index: {}]   ;;  %s2120_s2 = inlined_call_operand.vmem [shape: f32[1,32], index: 2, kind: input, shape index: {}]   ;;  %s2121_s3 = inlined_call_operand.vmem [shape: bf16[32,32], index: 3, kind: input, shape index: {}]   ;;  %s2122_s4 = inlined_call_operand.vmem [shape: f32[1,32], index: 4, kind: input, shape index: {}]   ;;  %s2123_s5 = inlined_call_operand.vmem [shape: bf16[1,32,512], index: 5, kind: input, shape index: {}]   ;;  %s2124_s6 = inlined_call_operand.vmem [shape: bf16[1,512,16], index: 6, kind: input, shape index: {}]   ;;  %s2125_s7 = inlined_call_operand.vmem [shape: bf16[64,16], index: 7, kind: input, shape index: {}]   ;;  %s2126_s8 = inlined_call_operand.vmem [shape: f32[1,16], index: 8, kind: input, shape index: {}]   ;;  %s2127_s9 = inlined_call_operand.vmem [shape: bf16[16,128], index: 9, kind: input, shape index: {}]   ;;  %s2128_s10 = inlined_call_operand.vmem [shape: f32[1,128], index: 10, kind: input, shape index: {}]   ;;  %s2129_s11 = inlined_call_operand.vmem [shape: f32[2], index: 11, kind: input, shape index: {}]   ;;  %s2130_s12 = inlined_call_operand.hbm [shape: f32[16,128], index: 12, kind: output, shape index: {}]  }
   0x1   :  { %2131 = sst [smem:[#allocation10_spill]] %s2118_s0 }
   0x2   :  { %2132 = sst [smem:[#allocation11_spill]] %s2119_s1 }
   0x3   :  { %2133 = sst [smem:[#allocation12_spill]] %s2120_s2 }
   0x4   :  { %17 = vsyncpa [#allocation6], 0 }
   0x5   :  { %18 = vsyncpa [#allocation5], 0 }
   0x6   :  { %20 = vsyncpa [#allocation5 + $0x1], 0  ;;  %s1783_s21 = smov 0   ;;  %s1785_s22 = smov 0  }
   0x7   :  { %s1787_s23 = smov 0   ;;  %s1789_s24 = smov 0  }
   0x8   :  { %s1791_s25 = smov 0   ;;  %s1793_s26 = smov 0  }
   0x9 LB: > { %s1324_s27 = sadd.s32 4294967295, %s1708_s26   ;;  %s1325_s28 = sadd.s32 4294967294, %s1708_s26   ;;  %s1708_s26 = sphi %s1793_s26, %s26_s26   ;;  %s1704_s25 = sphi %s1791_s25, %s2145_s25   ;;  %s1700_s24 = sphi %s1789_s24, %s2144_s24   ;;  %s1696_s23 = sphi %s1787_s23, %s2143_s23   ;;  %s1692_s22 = sphi %s1785_s22, %s2142_s22   ;;  %s1688_s21 = sphi %s1783_s21, %s2141_s21  }
   0xa   : > { %s38_s29 = sadd.s32 1, %s1704_s25  ;;  %s302_s30 = sadd.s32 1, %s1696_s23 }
   0xb   : > { %p40_p0 = scmp.ge.s32.totalorder %s38_s29, 2  ;;  %p312_p1 = scmp.ne.s32.totalorder %s1696_s23, %s1692_s22 }
   0xc   : > { %p313_p2 = scmp.eq.s32.totalorder %s1324_s27, 1  ;;  %p318_p3 = scmp.ne.s32.totalorder %s1692_s22, %s1688_s21 }
   0xd   : > { %s2147_s29 = smov (%p40_p0, %s38_s29), 0  ;;  %p319_p5 = scmp.eq.s32.totalorder %s1325_s28, 1 }
   0xe   : > { %p1823_p4 = por %p313_p2, %p312_p1  ;;  %s299_s14 = ssub.s32 %s1704_s25, %s2147_s29 }
   0xf   : > { %p1326_p6 = scmp.ge.s32.totalorder %s1708_s26, 1  ;;  %p300_p7 = scmp.eq.s32.totalorder %s299_s14, 0 }
  0x10   : > { %p1830_p8 = por %p319_p5, %p318_p3  ;;  %p326_p9 = scmp.lt.s32.totalorder %s1708_s26, 3 }
  0x11   : > { %s1836_s16 = scalar_select %p300_p7, %s1696_s23, %s302_s30  }
  0x12   : > { %p1838_p10 = pnand %p1326_p6, %p326_p9  ;;  %p1842_p11 = scmp.eq.s32.totalorder %s1324_s27, 0 }
  0x13   : > { %s369_s28 = sshll.u32 %s2129_s11, 4  ;;  %s370_s28 = int_to_ptr.vmem [resolvable:$true] %s369_s28 }
  0x14   : > { %p1494_p12 = pneg %p1838_p10  ;;  %s1613_s30 = scalar_lea.vmem %s370_s28, 16 }
  0x15   : > { %p1614_p0 = scmp.ne.s32.totalorder %s370_s28, %s1613_s30  ;;  %p1621_p5 = scmp.lt.s32.totalorder %s370_s28, %s370_s28 }
  0x16   : > { %p1495_p13 = pnand %p1842_p11, %p1494_p12  ;;  %p1622_p6 = scmp.lt.s32.totalorder %s1613_s30, %s1613_s30 }
  0x18   : > { %p1615_p1 = pneg %p1495_p13  ;;  %p1623_p7 = por %p1622_p6, %p1621_p5 }
  0x1a   : > { %p1616_p2 = pnand %p1615_p1, %p1614_p0 }
  0x1c   : > { %p1617_p3 = pneg %p1616_p2 }
  0x1e   : > { %p1624_p9 = pnand %p1623_p7, %p1617_p3 }
  0x20   : > { %1627 = shalt.err (!%p1624_p9)
}
  0x21   : > { %s1710_s27 = smov [#allocation4]   ;;  %389 = sbr.rel (%p1838_p10) target bundleno = 1026 (0x402), region = 68 }
  0x22   : > { %1497 = dma.vmem_to_smem (!%p1495_p13), %s370_s28, 16, %s1710_s27, [#allocation6]  }
  0x26   : > { %1679 = dma.done.wait (%p1842_p11), [#allocation6], 16  }
  0x27   : > { %1681 = vsyncadd (%p1842_p11), [#allocation6], 4294967280 }
  0x28   : > { %395 = sfence }
  0x29   : > { %s2138_s1 = sld [smem:[#allocation11_spill]]  ;;  %v1711_v1 = vmov 0.0   ;;  %vm1712_vm0 = vmmov 0   ;;  %p431_p10 = scmp.lt.s32.totalorder %s1700_s24, 1  ;;  %v1562_v3 = vld [vmem:[%s2121_s3 + $0x8] sm:$0xff]   ;;  %vm468_vm2 = vcmask 261120  }
  0x2a   : > { %1454 = vmatprep.subr.bf16.mxu0 %v1711_v1  ;;  %1462 = vmatprep.subr.bf16.mxu1 %v1711_v1  ;;  %s436_s18 = sld [smem:[#allocation4]]  ;;  %v1563_v10 = vld [vmem:[%s2121_s3] sm:$0xff]   ;;  %v1713_v22 = vmov 0   ;;  %v1572_v23 = vld [vmem:[%s2123_s5 + $0x2c] ss:$16 sps:$4 sm:$0xff]   ;;  %v1579_v30 = vld [vmem:[%s2124_s6 + $0xf0] sm:$0xff]  }
  0x2b   : > { %1458 = vmatprep.mubr.msk.bf16.mxu0 %vm1712_vm0, %v1711_v1  ;;  %1466 = vmatprep.mubr.msk.bf16.mxu1 %vm1712_vm0, %v1711_v1  ;;  %s432_s27 = scalar_select %p431_p10, %s1700_s24, 1  ;;  %v1566_v11 = vld [vmem:[%s2123_s5 + $0x24] ss:$16 sps:$4 sm:$0xff]   ;;  %v1564_v16 = vld [vmem:[%s2123_s5 + $0x20] ss:$16 sps:$4 sm:$0xff]   ;;  %v1576_v27 = vld [vmem:[%s2124_s6 + $0xf8] sm:$0xff]  }
  0x2c   : > { %1463 = vmatpush3.bf16.msra.mxu1 %v1562_v3  ;;  %s2139_s0 = sld [smem:[#allocation10_spill]]  ;;  %v1569_v18 = vld [vmem:[%s2123_s5 + $0x4] ss:$16 sps:$4 sm:$0xff]   ;;  %v1567_v21 = vld [vmem:[%s2123_s5] ss:$16 sps:$4 sm:$0xff]   ;;  %v1577_v28 = vld [vmem:[%s2125_s7 + $0x18] sm:$0xff]  }
  0x2d   : > { %s1332_s14 = sshll.u32 %s432_s27, 2  ;;  %1464 = vmatprep.subr.bf16.mxu1 %v1711_v1  ;;  %s2140_s2 = sld [smem:[#allocation12_spill]]  ;;  %v1570_v24 = vld [vmem:[%s2123_s5 + $0x28] ss:$16 sps:$4 sm:$0xff]   ;;  %v1575_v25 = vld [vmem:[%s2123_s5 + $0xc] ss:$16 sps:$4 sm:$0xff]  }
  0x2e   : > { %v1573_v26 = vld [vmem:[%s2123_s5 + $0x8] ss:$16 sps:$4 sm:$0xff]   ;;  %v1580_v31 = vld [vmem:[%s2125_s7 + $0x10] sm:$0xff]   ;;  %v1585_v36 = vld [vmem:[%s2124_s6 + $0xe0] sm:$0xff]   ;;  %s1714_s28 = smov 32   ;;  %s1715_s30 = smov 64  }
  0x2f   : > { %v1560_v0 = vld [vmem:[%s2138_s1 + $0x8] sm:$0xff]   ;;  %v1561_v2 = vld [vmem:[%s2138_s1] sm:$0xff]   ;;  %v1578_v29 = vld [vmem:[%s2124_s6 + $0xb8] sm:$0xff]   ;;  %vm627_vm3 = vcmask 523264   ;;  %vm686_vm4 = vcmask 785408   ;;  %vm670_vm5 = vcmask 130048  }
  0x30   : > { %1455 = vmatpush3.bf16.msra.mxu0 %v1560_v0  ;;  %v441_v5 = vstv %s436_s18  ;;  %1465 = vmatpush3.bf16.msra.mxu1 %v1563_v10  ;;  %v1581_v32 = vld [vmem:[%s2124_s6 + $0xb0] sm:$0xff]   ;;  %v1582_v33 = vld [vmem:[%s2124_s6 + $0xe8] sm:$0xff]   ;;  %v1586_v37 = vld [vmem:[%s2125_s7] sm:$0xff]   ;;  %s1333_s19 = sld [smem:[#allocation4 + $0x1]]  ;;  %s428_s17 = sand.u32 1, %s1692_s22  }
  0x31   : > { %1456 = vmatprep.subr.bf16.mxu0 %v1711_v1  ;;  %752 = vmatprep.subr.bf16.mxu1 %v1566_v11  ;;  %v1583_v34 = vld [vmem:[%s2125_s7 + $0x8] sm:$0xff]   ;;  %v1587_v38 = vld [vmem:[%s2124_s6 + $0xa0] sm:$0xff]   ;;  %v1588_v39 = vld [vmem:[%s2124_s6 + $0x78] sm:$0xff]  }
  0x32   : > { %s434_s20 = scalar_lea.vmem %s2139_s0, %s1332_s14  ;;  %v1584_v35 = vld [vmem:[%s2124_s6 + $0xa8] sm:$0xff]   ;;  %v1589_v40 = vld [vmem:[%s2124_s6 + $0xd8] sm:$0xff]   ;;  %v1593_v42 = vld [vmem:[%s2124_s6 + $0xd0] sm:$0xff]   ;;  %s1716_s0 = smov 96  }
  0x33   : > { %v1882_v4 = vld [vmem:[%s434_s20] sm:$0xf]  ;;  %v1591_v41 = vld [vmem:[%s2124_s6 + $0x98] sm:$0xff]   ;;  %v1595_v44 = vld [vmem:[%s2124_s6 + $0x90] sm:$0xff]   ;;  %s1331_s20 = sshll.u32 %s428_s17, 3 }
  0x34   : > { %1457 = vmatpush3.bf16.msra.mxu0 %v1561_v2  ;;  %v439_v6 = vunpack.c.l.bf16 %v1882_v4  ;;  %v1334_v12 = vld [vmem:[%s2140_s2] ss:$0 sm:$0xff]  ;;  %v1597_v47 = vld [vmem:[%s2124_s6 + $0xc8] sm:$0xff]   ;;  %v1590_v3 = vld [vmem:[%s2124_s6 + $0x38] sm:$0xff]   ;;  %s430_s1 = scalar_lea.vmem [#allocation7], %s1331_s20 }
  0x35   : > { %1470 = vmatprep.subr.bf16.mxu0 %v1711_v1  ;;  %v1338_v43 = vld [vmem:[%s2122_s4] ss:$0 sm:$0xff]  ;;  %v1599_v49 = vld [vmem:[%s2124_s6 + $0x88] sm:$0xff]   ;;  %s1248_s27 = sshll.u32 %s430_s1, 4  ;;  %s2074_s27 = int_to_ptr.vmem [resolvable:$true] %s1248_s27 }
  0x36   : > { %vm440_vm1 = vcmp.gt.f32.partialorder %v439_v6, 0.0  ;;  %v442_v7 = vmul.f32 %v441_v5, %v439_v6  ;;  %v1601_v53 = vld [vmem:[%s2124_s6 + $0xc0] sm:$0xff]   ;;  %v1598_v10 = vld [vmem:[%s2124_s6 + $0x28] sm:$0xff]  }
  0x37   : > { %v1603_v55 = vld [vmem:[%s2124_s6 + $0x80] sm:$0xff]  }
  0x38   : > { %v443_v8 = vsel %vm440_vm1, %v439_v6, %v442_v7  ;;  %v1592_v6 = vld [vmem:[%s2124_s6 + $0x70] sm:$0xff]  }
  0x39   : > { %v444_v9 = vpack.c.bf16 %v443_v8, %v443_v8  ;;  %v1594_v8 = vld [vmem:[%s2124_s6 + $0x30] sm:$0xff]  }
  0x3b   : > { %1459 = vmatmul.mubr.msk.bf16.vlgmr.msra.gmra.mxu0 %vm468_vm2, %v444_v9  ;;  %v1596_v9 = vld [vmem:[%s2124_s6 + $0x68] sm:$0xff]  }
  0x3c   : > { %1478 = vmatprep.mubr.msk.bf16.mxu0 %vm1712_vm0, %v1711_v1  ;;  %1471 = vmatpush3.bf16.msra.mxu0 %v1577_v28  ;;  %v1608_v28 = vld [vmem:[%s2124_s6 + $0x48] sm:$0xff]  }
  0x3d   : > { %1472 = vmatprep.subr.bf16.mxu0 %v1711_v1 }
  0x40   : > { %1473 = vmatpush3.bf16.msra.mxu0 %v1580_v31  ;;  %v1611_v31 = vld [vmem:[%s2124_s6] sm:$0xff]  }
  0x41   : > { %1474 = vmatprep.subr.bf16.mxu0 %v1711_v1 }
  0x44   : > { %1475 = vmatpush3.bf16.msra.mxu0 %v1583_v34  ;;  %v1612_v34 = vld [vmem:[%s2127_s9] sm:$0xff]  }
  0x45   : > { %1476 = vmatprep.subr.bf16.mxu0 %v1711_v1 }
  0x48   : > { %1477 = vmatpush3.bf16.msra.mxu0 %v1586_v37 }
  0x49   : > { %1408 = vmatprep.subr.bf16.mxu0 %v1588_v39 }
  0xfb   : > { %v506_v13 = vpop.f32.mrf.mxu0 }
  0xfc   : > { %v1897_v14 = vadd.f32 %v1334_v12, %v506_v13 }
  0xfd   : > { %v1460_v15 = vpop.f32.mrf.mxu0 }
  0xfe   : > { %v512_v17 = vpack.c.bf16 %v1897_v14, %v1897_v14 }
  0xff   : > { %v509_v19 = vpop.f32.mrf.mxu0 }
 0x100   : > { %1467 = vmatmul.mubr.msk.bf16.vlgmr.msra.gmra.mxu1 %vm468_vm2, %v512_v17  ;;  %v1602_v17 = vld [vmem:[%s2124_s6 + $0x20] sm:$0xff]  }
 0x101   : > { %v1461_v20 = vpop.f32.mrf.mxu0  ;;  %753 = vmatpush1.bf16.msra.mxu1 %v1564_v16  ;;  %772 = vmatprep.mubr.bf16.mxu1 %v1713_v22 }
 0x102   : > { %754 = vmatprep.subr.bf16.mxu1 %v1569_v18 }
 0x105   : > { %755 = vmatpush1.bf16.msra.mxu1 %v1567_v21  ;;  %v1604_v21 = vld [vmem:[%s2124_s6 + $0x58] sm:$0xff]  }
 0x106   : > { %793 = vmatprep.subr.bf16.mxu1 %v1572_v23 }
 0x108   : > { %1356 = vmatmul.mubr.msk.bf16.vlgmr.msra.gmra.mxu1 %vm468_vm2, %v1882_v4 }
 0x109   : > { %794 = vmatpush1.bf16.msra.mxu1 %v1570_v24  ;;  %813 = vmatprep.mubr.bf16.mxu1 %v1713_v22 }
 0x10a   : > { %795 = vmatprep.subr.bf16.mxu1 %v1575_v25  ;;  %v1605_v25 = vld [vmem:[%s2124_s6 + $0x18] sm:$0xff]  }
 0x10d   : > { %796 = vmatpush1.bf16.msra.mxu1 %v1573_v26  ;;  %v1606_v26 = vld [vmem:[%s2124_s6 + $0x50] sm:$0xff]  }
 0x10e   : > { %1430 = vmatprep.subr.bf16.mxu1 %v1576_v27  ;;  %v1607_v27 = vld [vmem:[%s2124_s6 + $0x10] sm:$0xff]  }
 0x110   : > { %1357 = vmatmul.mubr.msk.bf16.vlgmr.msra.gmra.mxu1 %vm468_vm2, %v1882_v4 }
 0x111   : > { %1431 = vmatpush3.bf16.msra.mxu1 %v1578_v29  ;;  %v1609_v29 = vld [vmem:[%s2124_s6 + $0x8] sm:$0xff]  }
 0x112   : > { %1432 = vmatprep.subr.bf16.mxu1 %v1579_v30  ;;  %v1610_v30 = vld [vmem:[%s2124_s6 + $0x40] sm:$0xff]  }
 0x115   : > { %1433 = vmatpush3.bf16.msra.mxu1 %v1581_v32 }
 0x116   : > { %1434 = vmatprep.subr.bf16.mxu1 %v1582_v33 }
 0x119   : > { %1435 = vmatpush3.bf16.msra.mxu1 %v1584_v35  ;;  %v1342_v35 = vld [vmem:[%s2126_s8] ss:$0 sm:$0xff] }
 0x11a   : > { %1436 = vmatprep.subr.bf16.mxu1 %v1585_v36 }
 0x11d   : > { %1437 = vmatpush3.bf16.msra.mxu1 %v1587_v38 }
 0x11e   : > { %1438 = vmatprep.subr.bf16.mxu1 %v1589_v40 }
 0x121   : > { %1439 = vmatpush3.bf16.msra.mxu1 %v1591_v41 }
 0x122   : > { %1440 = vmatprep.subr.bf16.mxu1 %v1593_v42 }
 0x125   : > { %1441 = vmatpush3.bf16.msra.mxu1 %v1595_v44 }
 0x126   : > { %1442 = vmatprep.subr.bf16.mxu1 %v1597_v47 }
 0x129   : > { %1443 = vmatpush3.bf16.msra.mxu1 %v1599_v49 }
 0x12a   : > { %1444 = vmatprep.subr.bf16.mxu1 %v1601_v53  ;;  %v1171_v53 = vstv %s1333_s19 }
 0x12d   : > { %1445 = vmatpush3.bf16.msra.mxu1 %v1603_v55 }
 0x1c0   : > { %v573_v45 = vpop.f32.mrf.mxu1 }
 0x1c1   : > { %v574_v46 = vadd.f32 %v1338_v43, %v573_v45 }
 0x1c2   : > { %v1468_v48 = vpop.f32.mrf.mxu1 }
 0x1c3   : > { %v579_v50 = vadd.f32 %v574_v46, %v1897_v14 }
 0x1c4   : > { %v576_v51 = vpop.f32.mrf.mxu1 }
 0x1c5   : > { %580 = vst.msk [vmem:[#allocation2] sm:$0xff] %vm468_vm2, %v579_v50  ;;  %v581_v52 = vpack.c.bf16 %v579_v50, %v579_v50 }
 0x1c6   : > { %v1469_v54 = vpop.f32.mrf.mxu1 }
 0x1c7   : > { %583 = vrot.lane.b32.xlu0 %v581_v52, %s1714_s28 }
 0x1c8   : > { %v1998_v56 = vpop.f32.mrf.mxu1 }
 0x1c9   : > { %v822_v32 = vpack.c.bf16 %v1998_v56, %v1998_v56 }
 0x1ca   : > { %v776_v57 = vpop.f32.mrf.mxu1 }
 0x1cb   : > { %v823_v14 = vpack.c.bf16 %v776_v57, %v776_v57 }
 0x1cc   : > { %v672_v58 = vld [vmem:[#allocation2] sm:$0xff]  ;;  %v778_v59 = vpop.f32.mrf.mxu1 }
 0x1cd   : > { %v673_v60 = vpack.c.bf16 %v672_v58, %v672_v58  ;;  %v1390_v58 = vld [vmem:[%s2128_s10] ss:$0 sm:$0xff] }
 0x1ce   : > { %v779_v61 = vpop.f32.mrf.mxu1 }
 0x1cf   : > { %677 = vrot.lane.b32.xlu1 %v673_v60, %s1715_s30  ;;  %675 = vrot.lane.b32.xlu0 %v673_v60, %s1714_s28  ;;  %s1235_s28 = scalar_lea.sflag [#allocation5], %s428_s17  ;;  %s1628_s30 = scalar_lea.vmem %s2074_s27, 128 }
 0x1d0   : > { %v815_v62 = vpop.f32.mrf.mxu1  ;;  %p1629_p11 = scmp.ne.s32.totalorder %s2074_s27, %s1628_s30 }
 0x1d1   : > { %v824_v15 = vpack.c.bf16 %v815_v62, %v815_v62 }
 0x1d2   : > { %v817_v63 = vpop.f32.mrf.mxu1  ;;  %p1630_p12 = pnand %p1629_p11, %p1823_p4 }
 0x1d3   : > { %679 = vrot.lane.b32.xlu1 %v673_v60, %s1716_s0  ;;  %v825_v16 = vpack.c.bf16 %v817_v63, %v817_v63  ;;  %s1394_s0 = sshll.u32 %s1700_s24, 7  ;;  %s1717_s24 = smov [#allocation7]  }
 0x1d4   : > { %v819_v0 = vpop.f32.mrf.mxu1  ;;  %s2072_s19 = scalar_lea.hbm %s2130_s12, %s1394_s0  ;;  %p1631_p13 = pneg %p1630_p12 }
 0x1d5   : > { %s1632_s20 = sshll.u32 %s1717_s24, 4  ;;  %s1633_s20 = int_to_ptr.vmem [resolvable:$false] %s1632_s20 }
 0x1d6   : > { %v820_v2 = vpop.f32.mrf.mxu1  ;;  %s1634_s14 = scalar_lea.vmem %s1633_s20, 256  ;;  %p1635_p0 = scmp.lt.s32.totalorder %s2074_s27, %s1633_s20 }
 0x1d7   : > { %p1636_p1 = scmp.lt.s32.totalorder %s1634_s14, %s1628_s30 }
 0x1d9   : > { %p1637_p2 = por %p1636_p1, %p1635_p0 }
 0x1db   : > { %p1638_p3 = pnand %p1637_p2, %p1631_p13 }
 0x239   : > { %v584_v5 = vpop.permute.xlu0 %583 }
 0x23a   : > { %v587_v7 = vsel %vm468_vm2, %v1882_v4, %v584_v5  ;;  %v1600_v4 = vld [vmem:[%s2124_s6 + $0x60] sm:$0xff]  }
 0x23b   : > { %1479 = vmatmul.mubr.msk.bf16.vlgmr.msra.gmra.mxu0 %vm627_vm3, %v587_v7 }
 0x23c   : > { %1409 = vmatpush3.bf16.msra.mxu0 %v1590_v3 }
 0x23d   : > { %1410 = vmatprep.subr.bf16.mxu0 %v1592_v6 }
 0x240   : > { %1411 = vmatpush3.bf16.msra.mxu0 %v1594_v8 }
 0x241   : > { %v678_v11 = vpop.permute.xlu1 %677  ;;  %v676_v12 = vpop.permute.xlu0 %675  ;;  %1412 = vmatprep.subr.bf16.mxu0 %v1596_v9 }
 0x242   : > { %v683_v13 = vsel %vm468_vm2, %v673_v60, %v676_v12 }
 0x243   : > { %v685_v19 = vsel %vm627_vm3, %v683_v13, %v678_v11 }
 0x244   : > { %1413 = vmatpush3.bf16.msra.mxu0 %v1598_v10 }
 0x245   : > { %v680_v18 = vpop.permute.xlu1 %679  ;;  %1414 = vmatprep.subr.bf16.mxu0 %v1600_v4 }
 0x246   : > { %v688_v20 = vsel %vm686_vm4, %v685_v19, %v680_v18 }
 0x247   : > { %v828_v22 = vmul.bf16 %v824_v15, %v688_v20  ;;  %v827_v23 = vmul.bf16 %v823_v14, %v688_v20  ;;  %v829_v24 = vmul.bf16 %v825_v16, %v688_v20  ;;  %v826_v33 = vmul.bf16 %v822_v32, %v688_v20 }
 0x248   : > { %1415 = vmatpush3.bf16.msra.mxu0 %v1602_v17 }
 0x249   : > { %1119 = vmatprep.mubr.bf16.mxu0 %v827_v23  ;;  %1159 = vmatprep.mubr.bf16.mxu1 %v829_v24 }
 0x24a   : > { %1416 = vmatprep.subr.bf16.mxu0 %v1604_v21  ;;  %1160 = vmatmul.mubr.bf16.vlgmr.msra.gmra.mxu1 %v828_v22 }
 0x24c   : > { %1417 = vmatpush3.bf16.msra.mxu0 %v1605_v25 }
 0x24d   : > { %1418 = vmatprep.subr.bf16.mxu0 %v1606_v26 }
 0x250   : > { %1419 = vmatpush3.bf16.msra.mxu0 %v1607_v27 }
 0x251   : > { %1420 = vmatprep.subr.bf16.mxu0 %v1608_v28 }
 0x254   : > { %1421 = vmatpush3.bf16.msra.mxu0 %v1609_v29 }
 0x255   : > { %1422 = vmatprep.subr.bf16.mxu0 %v1610_v30 }
 0x258   : > { %1423 = vmatpush3.bf16.msra.mxu0 %v1611_v31 }
 0x259   : > { %1482 = vmatprep.subr.bf16.mxu0 %v1711_v1 }
 0x25b   : > { %1120 = vmatmul.mubr.bf16.vlgmr.msra.gmra.mxu0 %v826_v33 }
 0x25c   : > { %1484 = vmatprep.mubr.msk.bf16.mxu0 %vm1712_vm0, %v1711_v1  ;;  %1483 = vmatpush3.bf16.msra.mxu0 %v1612_v34 }
 0x2fb   : > { %v664_v36 = vpop.f32.mrf.mxu0 }
 0x2fc   : > { %v665_v37 = vadd.f32 %v1342_v35, %v664_v36 }
 0x2fd   : > { %v1480_v38 = vpop.f32.mrf.mxu0 }
 0x2fe   : > { %671 = vst.msk [vmem:[#allocation3] sm:$0xff] %vm670_vm5, %v665_v37 }
 0x2ff   : > { %v667_v39 = vpop.f32.mrf.mxu0 }
 0x301   : > { %v1481_v40 = vpop.f32.mrf.mxu0 }
 0x305   : > { %v830_v50 = vld [vmem:[#allocation3] sm:$0xff] }
 0x30a   : > { %v1446_v41 = vpop.f32.mrf.mxu1 }
 0x30c   : > { %v1447_v42 = vpop.f32.mrf.mxu1 }
 0x30d   : > { %v1448_v46 = vadd.f32 %v1447_v42, %v1446_v41 }
 0x30e   : > { %v1449_v1 = vpop.f32.mrf.mxu1 }
 0x310   : > { %v1450_v43 = vpop.f32.mrf.mxu1 }
 0x31b   : > { %v1424_v44 = vpop.f32.mrf.mxu0 }
 0x31d   : > { %v1425_v45 = vpop.f32.mrf.mxu0 }
 0x31e   : > { %v1426_v47 = vadd.f32 %v1425_v45, %v1424_v44 }
 0x31f   : > { %v1427_v48 = vpop.f32.mrf.mxu0 }
 0x320   : > { %v1162_v49 = vadd.f32 %v1448_v46, %v1426_v47 }
 0x321   : > { %v1428_v51 = vpop.f32.mrf.mxu0 }
 0x322   : > { %v1167_v52 = vadd.f32 %v1162_v49, %v830_v50 }
 0x324   : > { %1168 = vst.msk [vmem:[#allocation3] sm:$0xff] %vm670_vm5, %v1167_v52 }
 0x32b   : > { %v1169_v54 = vld [vmem:[#allocation3] sm:$0xff] }
 0x32c   : > { %vm1170_vm6 = vcmp.gt.f32.partialorder %v1169_v54, 0.0  ;;  %v1172_v55 = vmul.f32 %v1171_v53, %v1169_v54 }
 0x32e   : > { %v1173_v56 = vsel %vm1170_vm6, %v1169_v54, %v1172_v55 }
 0x32f   : > { %v1174_v57 = vpack.c.bf16 %v1173_v56, %v1173_v56 }
 0x331   : > { %1485 = vmatmul.mubr.msk.bf16.vlgmr.msra.gmra.mxu0 %vm670_vm5, %v1174_v57 }
 0x3f1   : > { %v1227_v59 = vpop.f32.mrf.mxu0 }
 0x3f2   : > { %v1228_v60 = vadd.f32 %v1390_v58, %v1227_v59 }
 0x3f3   : > { %v1486_v61 = vpop.f32.mrf.mxu0 }
 0x3f4   : > { %1233 = vst [vmem:[%s430_s1] sm:$0xff] %v1228_v60 }
 0x3f5   : > { %v1230_v62 = vpop.f32.mrf.mxu0 }
 0x3f6   : > { %1641 = shalt.err (!%p1638_p3)
}
 0x3f7   : > { %s1642_s0 = scalar_lea.hbm %s2072_s19, 128  ;;  %s1646_s18 = scalar_lea.hbm %s2130_s12, 256 }
 0x3f8   : > { %p1643_p5 = scmp.ne.s32.totalorder %s2072_s19, %s1642_s0  ;;  %p1647_p9 = scmp.lt.s32.totalorder %s2072_s19, %s2130_s12 }
 0x3f9   : > { %p1648_p10 = scmp.lt.s32.totalorder %s1646_s18, %s1642_s0 }
 0x3fa   : > { %p1644_p6 = pnand %p1643_p5, %p1823_p4 }
 0x3fb   : > { %p1649_p11 = por %p1648_p10, %p1647_p9 }
 0x3fc   : > { %p1645_p7 = pneg %p1644_p6 }
 0x3fe   : > { %p1650_p12 = pnand %p1649_p11, %p1645_p7 }
 0x400   : > { %1653 = shalt.err (!%p1650_p12)
}
 0x401   : > { %1492 = dma.vmem_to_hbm [thread:$0]  (%p1823_p4), %s2074_s27, 128, %s2072_s19, %s1235_s28   ;;  %v1487_v63 = vpop.f32.mrf.mxu0 }
 0x402 PF: > { %p1504_p13 = scmp.ge.s32.totalorder %s1708_s26, 2  ;;  %s1260_s30 = sand.u32 1, %s1688_s21  }
 0x403   : > { %s1261_s2 = scalar_lea.sflag [#allocation5], %s1260_s30 }
 0x404   : > { %p1499_p0 = pnand %p1504_p13, %p1830_p8 }
 0x406   : > { %p1500_p1 = pneg %p1499_p0 }
 0x408   : > { %1683 = dma.done.wait (%p1500_p1), %s1261_s2, 128  }
 0x409   : > { %1685 = vsyncadd (%p1500_p1), %s1261_s2, 4294967168  ;;  %s26_s26 = sadd.s32 1, %s1708_s26   ;;  %s2141_s21 = smov %s1692_s22 }
 0x40a   : > { %p23_p2 = scmp.ge.s32.totalorder %s26_s26, 4   ;;  %s2142_s22 = smov %s1696_s23 }
 0x40b   : > { %s2143_s23 = smov %s1836_s16  ;;  %s2144_s24 = smov %s1704_s25 }
 0x40c   : > { %s2145_s25 = smov %s2147_s29  ;;  %25 = sbr.rel (!%p23_p2) target bundleno = 9 (0x9), region = 108 }
 0x411   :  { %1266 = vsyncpa [#allocation5], 1 }
 0x412   :  { %1268 = vsyncpa [#allocation5 + $0x1], 1 }
 0x413   :  { %1269 = vsyncpa [#allocation6], 1 }
 0x414   :  { %1271 = vsyncpa [#allocation6 + $0x1], 1 }

// kernel: tpu_custom_call.1
= control target key start
LH: loop header
LB: loop body
LE: loop exit
PB: predicated region body
PF: predicated region fallthrough
CT: control target
= control target key end

     0   :  { %s2118_s0 = inlined_call_operand.vmem [shape: bf16[16,32], index: 0, kind: input, shape index: {}]   ;;  %s2119_s1 = inlined_call_operand.vmem [shape: bf16[32,32], index: 1, kind: input, shape index: {}]   ;;  %s2120_s2 = inlined_call_operand.vmem [shape: f32[1,32], index: 2, kind: input, shape index: {}]   ;;  %s2121_s3 = inlined_call_operand.vmem [shape: bf16[32,32], index: 3, kind: input, shape index: {}]   ;;  %s2122_s4 = inlined_call_operand.vmem [shape: f32[1,32], index: 4, kind: input, shape index: {}]   ;;  %s2123_s5 = inlined_call_operand.vmem [shape: bf16[1,32,512], index: 5, kind: input, shape index: {}]   ;;  %s2124_s6 = inlined_call_operand.vmem [shape: bf16[1,512,16], index: 6, kind: input, shape index: {}]   ;;  %s2125_s7 = inlined_call_operand.vmem [shape: bf16[64,16], index: 7, kind: input, shape index: {}]   ;;  %s2126_s8 = inlined_call_operand.vmem [shape: f32[1,16], index: 8, kind: input, shape index: {}]   ;;  %s2127_s9 = inlined_call_operand.vmem [shape: bf16[16,128], index: 9, kind: input, shape index: {}]   ;;  %s2128_s10 = inlined_call_operand.vmem [shape: f32[1,128], index: 10, kind: input, shape index: {}]   ;;  %s2129_s11 = inlined_call_operand.vmem [shape: f32[2], index: 11, kind: input, shape index: {}]   ;;  %s2130_s12 = inlined_call_operand.hbm [shape: f32[16,128], index: 12, kind: output, shape index: {}]  }
   0x1   :  { %2131 = sst [smem:[#allocation10_spill]] %s2118_s0 }
   0x2   :  { %2132 = sst [smem:[#allocation11_spill]] %s2119_s1 }
   0x3   :  { %2133 = sst [smem:[#allocation12_spill]] %s2120_s2 }
   0x4   :  { %17 = vsyncpa [#allocation6], 0 }
   0x5   :  { %18 = vsyncpa [#allocation5], 0 }
   0x6   :  { %20 = vsyncpa [#allocation5 + $0x1], 0  ;;  %s1783_s21 = smov 0   ;;  %s1785_s22 = smov 0  }
   0x7   :  { %s1787_s23 = smov 0   ;;  %s1789_s24 = smov 0  }
   0x8   :  { %s1791_s25 = smov 0   ;;  %s1793_s26 = smov 0  }
   0x9 LB: > { %s1324_s27 = sadd.s32 4294967295, %s1708_s26   ;;  %s1325_s28 = sadd.s32 4294967294, %s1708_s26   ;;  %s1708_s26 = sphi %s1793_s26, %s26_s26   ;;  %s1704_s25 = sphi %s1791_s25, %s2145_s25   ;;  %s1700_s24 = sphi %s1789_s24, %s2144_s24   ;;  %s1696_s23 = sphi %s1787_s23, %s2143_s23   ;;  %s1692_s22 = sphi %s1785_s22, %s2142_s22   ;;  %s1688_s21 = sphi %s1783_s21, %s2141_s21  }
   0xa   : > { %s38_s29 = sadd.s32 1, %s1704_s25  ;;  %s302_s30 = sadd.s32 1, %s1696_s23 }
   0xb   : > { %p40_p0 = scmp.ge.s32.totalorder %s38_s29, 2  ;;  %p312_p1 = scmp.ne.s32.totalorder %s1696_s23, %s1692_s22 }
   0xc   : > { %p313_p2 = scmp.eq.s32.totalorder %s1324_s27, 1  ;;  %p318_p3 = scmp.ne.s32.totalorder %s1692_s22, %s1688_s21 }
   0xd   : > { %s2147_s29 = smov (%p40_p0, %s38_s29), 0  ;;  %p319_p5 = scmp.eq.s32.totalorder %s1325_s28, 1 }
   0xe   : > { %p1823_p4 = por %p313_p2, %p312_p1  ;;  %s299_s14 = ssub.s32 %s1704_s25, %s2147_s29 }
   0xf   : > { %p1326_p6 = scmp.ge.s32.totalorder %s1708_s26, 1  ;;  %p300_p7 = scmp.eq.s32.totalorder %s299_s14, 0 }
  0x10   : > { %p1830_p8 = por %p319_p5, %p318_p3  ;;  %p326_p9 = scmp.lt.s32.totalorder %s1708_s26, 3 }
  0x11   : > { %s1836_s16 = scalar_select %p300_p7, %s1696_s23, %s302_s30  }
  0x12   : > { %p1838_p10 = pnand %p1326_p6, %p326_p9  ;;  %p1842_p11 = scmp.eq.s32.totalorder %s1324_s27, 0 }
  0x13   : > { %s369_s28 = sshll.u32 %s2129_s11, 4  ;;  %s370_s28 = int_to_ptr.vmem [resolvable:$true] %s369_s28 }
  0x14   : > { %p1494_p12 = pneg %p1838_p10  ;;  %s1613_s30 = scalar_lea.vmem %s370_s28, 16 }
  0x15   : > { %p1614_p0 = scmp.ne.s32.totalorder %s370_s28, %s1613_s30  ;;  %p1621_p5 = scmp.lt.s32.totalorder %s370_s28, %s370_s28 }
  0x16   : > { %p1495_p13 = pnand %p1842_p11, %p1494_p12  ;;  %p1622_p6 = scmp.lt.s32.totalorder %s1613_s30, %s1613_s30 }
  0x18   : > { %p1615_p1 = pneg %p1495_p13  ;;  %p1623_p7 = por %p1622_p6, %p1621_p5 }
  0x1a   : > { %p1616_p2 = pnand %p1615_p1, %p1614_p0 }
  0x1c   : > { %p1617_p3 = pneg %p1616_p2 }
  0x1e   : > { %p1624_p9 = pnand %p1623_p7, %p1617_p3 }
  0x20   : > { %1627 = shalt.err (!%p1624_p9)
}
  0x21   : > { %s1710_s27 = smov [#allocation4]   ;;  %389 = sbr.rel (%p1838_p10) target bundleno = 1026 (0x402), region = 68 }
  0x22   : > { %1497 = dma.vmem_to_smem (!%p1495_p13), %s370_s28, 16, %s1710_s27, [#allocation6]  }
  0x26   : > { %1679 = dma.done.wait (%p1842_p11), [#allocation6], 16  }
  0x27   : > { %1681 = vsyncadd (%p1842_p11), [#allocation6], 4294967280 }
  0x28   : > { %395 = sfence }
  0x29   : > { %s2138_s1 = sld [smem:[#allocation11_spill]]  ;;  %v1711_v1 = vmov 0.0   ;;  %vm1712_vm0 = vmmov 0   ;;  %p431_p10 = scmp.lt.s32.totalorder %s1700_s24, 1  ;;  %v1562_v3 = vld [vmem:[%s2121_s3 + $0x8] sm:$0xff]   ;;  %vm468_vm2 = vcmask 261120  }
  0x2a   : > { %1454 = vmatprep.subr.bf16.mxu0 %v1711_v1  ;;  %1462 = vmatprep.subr.bf16.mxu1 %v1711_v1  ;;  %s436_s18 = sld [smem:[#allocation4]]  ;;  %v1563_v10 = vld [vmem:[%s2121_s3] sm:$0xff]   ;;  %v1713_v22 = vmov 0   ;;  %v1572_v23 = vld [vmem:[%s2123_s5 + $0x2c] ss:$16 sps:$4 sm:$0xff]   ;;  %v1579_v30 = vld [vmem:[%s2124_s6 + $0xf0] sm:$0xff]  }
  0x2b   : > { %1458 = vmatprep.mubr.msk.bf16.mxu0 %vm1712_vm0, %v1711_v1  ;;  %1466 = vmatprep.mubr.msk.bf16.mxu1 %vm1712_vm0, %v1711_v1  ;;  %s432_s27 = scalar_select %p431_p10, %s1700_s24, 1  ;;  %v1566_v11 = vld [vmem:[%s2123_s5 + $0x24] ss:$16 sps:$4 sm:$0xff]   ;;  %v1564_v16 = vld [vmem:[%s2123_s5 + $0x20] ss:$16 sps:$4 sm:$0xff]   ;;  %v1576_v27 = vld [vmem:[%s2124_s6 + $0xf8] sm:$0xff]  }
  0x2c   : > { %1463 = vmatpush3.bf16.msra.mxu1 %v1562_v3  ;;  %s2139_s0 = sld [smem:[#allocation10_spill]]  ;;  %v1569_v18 = vld [vmem:[%s2123_s5 + $0x4] ss:$16 sps:$4 sm:$0xff]   ;;  %v1567_v21 = vld [vmem:[%s2123_s5] ss:$16 sps:$4 sm:$0xff]   ;;  %v1577_v28 = vld [vmem:[%s2125_s7 + $0x18] sm:$0xff]  }
  0x2d   : > { %s1332_s14 = sshll.u32 %s432_s27, 2  ;;  %1464 = vmatprep.subr.bf16.mxu1 %v1711_v1  ;;  %s2140_s2 = sld [smem:[#allocation12_spill]]  ;;  %v1570_v24 = vld [vmem:[%s2123_s5 + $0x28] ss:$16 sps:$4 sm:$0xff]   ;;  %v1575_v25 = vld [vmem:[%s2123_s5 + $0xc] ss:$16 sps:$4 sm:$0xff]  }
  0x2e   : > { %v1573_v26 = vld [vmem:[%s2123_s5 + $0x8] ss:$16 sps:$4 sm:$0xff]   ;;  %v1580_v31 = vld [vmem:[%s2125_s7 + $0x10] sm:$0xff]   ;;  %v1585_v36 = vld [vmem:[%s2124_s6 + $0xe0] sm:$0xff]   ;;  %s1714_s28 = smov 32   ;;  %s1715_s30 = smov 64  }
  0x2f   : > { %v1560_v0 = vld [vmem:[%s2138_s1 + $0x8] sm:$0xff]   ;;  %v1561_v2 = vld [vmem:[%s2138_s1] sm:$0xff]   ;;  %v1578_v29 = vld [vmem:[%s2124_s6 + $0xb8] sm:$0xff]   ;;  %vm627_vm3 = vcmask 523264   ;;  %vm686_vm4 = vcmask 785408   ;;  %vm670_vm5 = vcmask 130048  }
  0x30   : > { %1455 = vmatpush3.bf16.msra.mxu0 %v1560_v0  ;;  %v441_v5 = vstv %s436_s18  ;;  %1465 = vmatpush3.bf16.msra.mxu1 %v1563_v10  ;;  %v1581_v32 = vld [vmem:[%s2124_s6 + $0xb0] sm:$0xff]   ;;  %v1582_v33 = vld [vmem:[%s2124_s6 + $0xe8] sm:$0xff]   ;;  %v1586_v37 = vld [vmem:[%s2125_s7] sm:$0xff]   ;;  %s1333_s19 = sld [smem:[#allocation4 + $0x1]]  ;;  %s428_s17 = sand.u32 1, %s1692_s22  }
  0x31   : > { %1456 = vmatprep.subr.bf16.mxu0 %v1711_v1  ;;  %752 = vmatprep.subr.bf16.mxu1 %v1566_v11  ;;  %v1583_v34 = vld [vmem:[%s2125_s7 + $0x8] sm:$0xff]   ;;  %v1587_v38 = vld [vmem:[%s2124_s6 + $0xa0] sm:$0xff]   ;;  %v1588_v39 = vld [vmem:[%s2124_s6 + $0x78] sm:$0xff]  }
  0x32   : > { %s434_s20 = scalar_lea.vmem %s2139_s0, %s1332_s14  ;;  %v1584_v35 = vld [vmem:[%s2124_s6 + $0xa8] sm:$0xff]   ;;  %v1589_v40 = vld [vmem:[%s2124_s6 + $0xd8] sm:$0xff]   ;;  %v1593_v42 = vld [vmem:[%s2124_s6 + $0xd0] sm:$0xff]   ;;  %s1716_s0 = smov 96  }
  0x33   : > { %v1882_v4 = vld [vmem:[%s434_s20] sm:$0xf]  ;;  %v1591_v41 = vld [vmem:[%s2124_s6 + $0x98] sm:$0xff]   ;;  %v1595_v44 = vld [vmem:[%s2124_s6 + $0x90] sm:$0xff]   ;;  %s1331_s20 = sshll.u32 %s428_s17, 3 }
  0x34   : > { %1457 = vmatpush3.bf16.msra.mxu0 %v1561_v2  ;;  %v439_v6 = vunpack.c.l.bf16 %v1882_v4  ;;  %v1334_v12 = vld [vmem:[%s2140_s2] ss:$0 sm:$0xff]  ;;  %v1597_v47 = vld [vmem:[%s2124_s6 + $0xc8] sm:$0xff]   ;;  %v1590_v3 = vld [vmem:[%s2124_s6 + $0x38] sm:$0xff]   ;;  %s430_s1 = scalar_lea.vmem [#allocation7], %s1331_s20 }
  0x35   : > { %1470 = vmatprep.subr.bf16.mxu0 %v1711_v1  ;;  %v1338_v43 = vld [vmem:[%s2122_s4] ss:$0 sm:$0xff]  ;;  %v1599_v49 = vld [vmem:[%s2124_s6 + $0x88] sm:$0xff]   ;;  %s1248_s27 = sshll.u32 %s430_s1, 4  ;;  %s2074_s27 = int_to_ptr.vmem [resolvable:$true] %s1248_s27 }
  0x36   : > { %vm440_vm1 = vcmp.gt.f32.partialorder %v439_v6, 0.0  ;;  %v442_v7 = vmul.f32 %v441_v5, %v439_v6  ;;  %v1601_v53 = vld [vmem:[%s2124_s6 + $0xc0] sm:$0xff]   ;;  %v1598_v10 = vld [vmem:[%s2124_s6 + $0x28] sm:$0xff]  }
  0x37   : > { %v1603_v55 = vld [vmem:[%s2124_s6 + $0x80] sm:$0xff]  }
  0x38   : > { %v443_v8 = vsel %vm440_vm1, %v439_v6, %v442_v7  ;;  %v1592_v6 = vld [vmem:[%s2124_s6 + $0x70] sm:$0xff]  }
  0x39   : > { %v444_v9 = vpack.c.bf16 %v443_v8, %v443_v8  ;;  %v1594_v8 = vld [vmem:[%s2124_s6 + $0x30] sm:$0xff]  }
  0x3b   : > { %1459 = vmatmul.mubr.msk.bf16.vlgmr.msra.gmra.mxu0 %vm468_vm2, %v444_v9  ;;  %v1596_v9 = vld [vmem:[%s2124_s6 + $0x68] sm:$0xff]  }
  0x3c   : > { %1478 = vmatprep.mubr.msk.bf16.mxu0 %vm1712_vm0, %v1711_v1  ;;  %1471 = vmatpush3.bf16.msra.mxu0 %v1577_v28  ;;  %v1608_v28 = vld [vmem:[%s2124_s6 + $0x48] sm:$0xff]  }
  0x3d   : > { %1472 = vmatprep.subr.bf16.mxu0 %v1711_v1 }
  0x40   : > { %1473 = vmatpush3.bf16.msra.mxu0 %v1580_v31  ;;  %v1611_v31 = vld [vmem:[%s2124_s6] sm:$0xff]  }
  0x41   : > { %1474 = vmatprep.subr.bf16.mxu0 %v1711_v1 }
  0x44   : > { %1475 = vmatpush3.bf16.msra.mxu0 %v1583_v34  ;;  %v1612_v34 = vld [vmem:[%s2127_s9] sm:$0xff]  }
  0x45   : > { %1476 = vmatprep.subr.bf16.mxu0 %v1711_v1 }
  0x48   : > { %1477 = vmatpush3.bf16.msra.mxu0 %v1586_v37 }
  0x49   : > { %1408 = vmatprep.subr.bf16.mxu0 %v1588_v39 }
  0xfb   : > { %v506_v13 = vpop.f32.mrf.mxu0 }
  0xfc   : > { %v1897_v14 = vadd.f32 %v1334_v12, %v506_v13 }
  0xfd   : > { %v1460_v15 = vpop.f32.mrf.mxu0 }
  0xfe   : > { %v512_v17 = vpack.c.bf16 %v1897_v14, %v1897_v14 }
  0xff   : > { %v509_v19 = vpop.f32.mrf.mxu0 }
 0x100   : > { %1467 = vmatmul.mubr.msk.bf16.vlgmr.msra.gmra.mxu1 %vm468_vm2, %v512_v17  ;;  %v1602_v17 = vld [vmem:[%s2124_s6 + $0x20] sm:$0xff]  }
 0x101   : > { %v1461_v20 = vpop.f32.mrf.mxu0  ;;  %753 = vmatpush1.bf16.msra.mxu1 %v1564_v16  ;;  %772 = vmatprep.mubr.bf16.mxu1 %v1713_v22 }
 0x102   : > { %754 = vmatprep.subr.bf16.mxu1 %v1569_v18 }
 0x105   : > { %755 = vmatpush1.bf16.msra.mxu1 %v1567_v21  ;;  %v1604_v21 = vld [vmem:[%s2124_s6 + $0x58] sm:$0xff]  }
 0x106   : > { %793 = vmatprep.subr.bf16.mxu1 %v1572_v23 }
 0x108   : > { %1356 = vmatmul.mubr.msk.bf16.vlgmr.msra.gmra.mxu1 %vm468_vm2, %v1882_v4 }
 0x109   : > { %794 = vmatpush1.bf16.msra.mxu1 %v1570_v24  ;;  %813 = vmatprep.mubr.bf16.mxu1 %v1713_v22 }
 0x10a   : > { %795 = vmatprep.subr.bf16.mxu1 %v1575_v25  ;;  %v1605_v25 = vld [vmem:[%s2124_s6 + $0x18] sm:$0xff]  }
 0x10d   : > { %796 = vmatpush1.bf16.msra.mxu1 %v1573_v26  ;;  %v1606_v26 = vld [vmem:[%s2124_s6 + $0x50] sm:$0xff]  }
 0x10e   : > { %1430 = vmatprep.subr.bf16.mxu1 %v1576_v27  ;;  %v1607_v27 = vld [vmem:[%s2124_s6 + $0x10] sm:$0xff]  }
 0x110   : > { %1357 = vmatmul.mubr.msk.bf16.vlgmr.msra.gmra.mxu1 %vm468_vm2, %v1882_v4 }
 0x111   : > { %1431 = vmatpush3.bf16.msra.mxu1 %v1578_v29  ;;  %v1609_v29 = vld [vmem:[%s2124_s6 + $0x8] sm:$0xff]  }
 0x112   : > { %1432 = vmatprep.subr.bf16.mxu1 %v1579_v30  ;;  %v1610_v30 = vld [vmem:[%s2124_s6 + $0x40] sm:$0xff]  }
 0x115   : > { %1433 = vmatpush3.bf16.msra.mxu1 %v1581_v32 }
 0x116   : > { %1434 = vmatprep.subr.bf16.mxu1 %v1582_v33 }
 0x119   : > { %1435 = vmatpush3.bf16.msra.mxu1 %v1584_v35  ;;  %v1342_v35 = vld [vmem:[%s2126_s8] ss:$0 sm:$0xff] }
 0x11a   : > { %1436 = vmatprep.subr.bf16.mxu1 %v1585_v36 }
 0x11d   : > { %1437 = vmatpush3.bf16.msra.mxu1 %v1587_v38 }
 0x11e   : > { %1438 = vmatprep.subr.bf16.mxu1 %v1589_v40 }
 0x121   : > { %1439 = vmatpush3.bf16.msra.mxu1 %v1591_v41 }
 0x122   : > { %1440 = vmatprep.subr.bf16.mxu1 %v1593_v42 }
 0x125   : > { %1441 = vmatpush3.bf16.msra.mxu1 %v1595_v44 }
 0x126   : > { %1442 = vmatprep.subr.bf16.mxu1 %v1597_v47 }
 0x129   : > { %1443 = vmatpush3.bf16.msra.mxu1 %v1599_v49 }
 0x12a   : > { %1444 = vmatprep.subr.bf16.mxu1 %v1601_v53  ;;  %v1171_v53 = vstv %s1333_s19 }
 0x12d   : > { %1445 = vmatpush3.bf16.msra.mxu1 %v1603_v55 }
 0x1c0   : > { %v573_v45 = vpop.f32.mrf.mxu1 }
 0x1c1   : > { %v574_v46 = vadd.f32 %v1338_v43, %v573_v45 }
 0x1c2   : > { %v1468_v48 = vpop.f32.mrf.mxu1 }
 0x1c3   : > { %v579_v50 = vadd.f32 %v574_v46, %v1897_v14 }
 0x1c4   : > { %v576_v51 = vpop.f32.mrf.mxu1 }
 0x1c5   : > { %580 = vst.msk [vmem:[#allocation2] sm:$0xff] %vm468_vm2, %v579_v50  ;;  %v581_v52 = vpack.c.bf16 %v579_v50, %v579_v50 }
 0x1c6   : > { %v1469_v54 = vpop.f32.mrf.mxu1 }
 0x1c7   : > { %583 = vrot.lane.b32.xlu0 %v581_v52, %s1714_s28 }
 0x1c8   : > { %v1998_v56 = vpop.f32.mrf.mxu1 }
 0x1c9   : > { %v822_v32 = vpack.c.bf16 %v1998_v56, %v1998_v56 }
 0x1ca   : > { %v776_v57 = vpop.f32.mrf.mxu1 }
 0x1cb   : > { %v823_v14 = vpack.c.bf16 %v776_v57, %v776_v57 }
 0x1cc   : > { %v672_v58 = vld [vmem:[#allocation2] sm:$0xff]  ;;  %v778_v59 = vpop.f32.mrf.mxu1 }
 0x1cd   : > { %v673_v60 = vpack.c.bf16 %v672_v58, %v672_v58  ;;  %v1390_v58 = vld [vmem:[%s2128_s10] ss:$0 sm:$0xff] }
 0x1ce   : > { %v779_v61 = vpop.f32.mrf.mxu1 }
 0x1cf   : > { %677 = vrot.lane.b32.xlu1 %v673_v60, %s1715_s30  ;;  %675 = vrot.lane.b32.xlu0 %v673_v60, %s1714_s28  ;;  %s1235_s28 = scalar_lea.sflag [#allocation5], %s428_s17  ;;  %s1628_s30 = scalar_lea.vmem %s2074_s27, 128 }
 0x1d0   : > { %v815_v62 = vpop.f32.mrf.mxu1  ;;  %p1629_p11 = scmp.ne.s32.totalorder %s2074_s27, %s1628_s30 }
 0x1d1   : > { %v824_v15 = vpack.c.bf16 %v815_v62, %v815_v62 }
 0x1d2   : > { %v817_v63 = vpop.f32.mrf.mxu1  ;;  %p1630_p12 = pnand %p1629_p11, %p1823_p4 }
 0x1d3   : > { %679 = vrot.lane.b32.xlu1 %v673_v60, %s1716_s0  ;;  %v825_v16 = vpack.c.bf16 %v817_v63, %v817_v63  ;;  %s1394_s0 = sshll.u32 %s1700_s24, 7  ;;  %s1717_s24 = smov [#allocation7]  }
 0x1d4   : > { %v819_v0 = vpop.f32.mrf.mxu1  ;;  %s2072_s19 = scalar_lea.hbm %s2130_s12, %s1394_s0  ;;  %p1631_p13 = pneg %p1630_p12 }
 0x1d5   : > { %s1632_s20 = sshll.u32 %s1717_s24, 4  ;;  %s1633_s20 = int_to_ptr.vmem [resolvable:$false] %s1632_s20 }
 0x1d6   : > { %v820_v2 = vpop.f32.mrf.mxu1  ;;  %s1634_s14 = scalar_lea.vmem %s1633_s20, 256  ;;  %p1635_p0 = scmp.lt.s32.totalorder %s2074_s27, %s1633_s20 }
 0x1d7   : > { %p1636_p1 = scmp.lt.s32.totalorder %s1634_s14, %s1628_s30 }
 0x1d9   : > { %p1637_p2 = por %p1636_p1, %p1635_p0 }
 0x1db   : > { %p1638_p3 = pnand %p1637_p2, %p1631_p13 }
 0x239   : > { %v584_v5 = vpop.permute.xlu0 %583 }
 0x23a   : > { %v587_v7 = vsel %vm468_vm2, %v1882_v4, %v584_v5  ;;  %v1600_v4 = vld [vmem:[%s2124_s6 + $0x60] sm:$0xff]  }
 0x23b   : > { %1479 = vmatmul.mubr.msk.bf16.vlgmr.msra.gmra.mxu0 %vm627_vm3, %v587_v7 }
 0x23c   : > { %1409 = vmatpush3.bf16.msra.mxu0 %v1590_v3 }
 0x23d   : > { %1410 = vmatprep.subr.bf16.mxu0 %v1592_v6 }
 0x240   : > { %1411 = vmatpush3.bf16.msra.mxu0 %v1594_v8 }
 0x241   : > { %v678_v11 = vpop.permute.xlu1 %677  ;;  %v676_v12 = vpop.permute.xlu0 %675  ;;  %1412 = vmatprep.subr.bf16.mxu0 %v1596_v9 }
 0x242   : > { %v683_v13 = vsel %vm468_vm2, %v673_v60, %v676_v12 }
 0x243   : > { %v685_v19 = vsel %vm627_vm3, %v683_v13, %v678_v11 }
 0x244   : > { %1413 = vmatpush3.bf16.msra.mxu0 %v1598_v10 }
 0x245   : > { %v680_v18 = vpop.permute.xlu1 %679  ;;  %1414 = vmatprep.subr.bf16.mxu0 %v1600_v4 }
 0x246   : > { %v688_v20 = vsel %vm686_vm4, %v685_v19, %v680_v18 }
 0x247   : > { %v828_v22 = vmul.bf16 %v824_v15, %v688_v20  ;;  %v827_v23 = vmul.bf16 %v823_v14, %v688_v20  ;;  %v829_v24 = vmul.bf16 %v825_v16, %v688_v20  ;;  %v826_v33 = vmul.bf16 %v822_v32, %v688_v20 }
 0x248   : > { %1415 = vmatpush3.bf16.msra.mxu0 %v1602_v17 }
 0x249   : > { %1119 = vmatprep.mubr.bf16.mxu0 %v827_v23  ;;  %1159 = vmatprep.mubr.bf16.mxu1 %v829_v24 }
 0x24a   : > { %1416 = vmatprep.subr.bf16.mxu0 %v1604_v21  ;;  %1160 = vmatmul.mubr.bf16.vlgmr.msra.gmra.mxu1 %v828_v22 }
 0x24c   : > { %1417 = vmatpush3.bf16.msra.mxu0 %v1605_v25 }
 0x24d   : > { %1418 = vmatprep.subr.bf16.mxu0 %v1606_v26 }
 0x250   : > { %1419 = vmatpush3.bf16.msra.mxu0 %v1607_v27 }
 0x251   : > { %1420 = vmatprep.subr.bf16.mxu0 %v1608_v28 }
 0x254   : > { %1421 = vmatpush3.bf16.msra.mxu0 %v1609_v29 }
 0x255   : > { %1422 = vmatprep.subr.bf16.mxu0 %v1610_v30 }
 0x258   : > { %1423 = vmatpush3.bf16.msra.mxu0 %v1611_v31 }
 0x259   : > { %1482 = vmatprep.subr.bf16.mxu0 %v1711_v1 }
 0x25b   : > { %1120 = vmatmul.mubr.bf16.vlgmr.msra.gmra.mxu0 %v826_v33 }
 0x25c   : > { %1484 = vmatprep.mubr.msk.bf16.mxu0 %vm1712_vm0, %v1711_v1  ;;  %1483 = vmatpush3.bf16.msra.mxu0 %v1612_v34 }
 0x2fb   : > { %v664_v36 = vpop.f32.mrf.mxu0 }
 0x2fc   : > { %v665_v37 = vadd.f32 %v1342_v35, %v664_v36 }
 0x2fd   : > { %v1480_v38 = vpop.f32.mrf.mxu0 }
 0x2fe   : > { %671 = vst.msk [vmem:[#allocation3] sm:$0xff] %vm670_vm5, %v665_v37 }
 0x2ff   : > { %v667_v39 = vpop.f32.mrf.mxu0 }
 0x301   : > { %v1481_v40 = vpop.f32.mrf.mxu0 }
 0x305   : > { %v830_v50 = vld [vmem:[#allocation3] sm:$0xff] }
 0x30a   : > { %v1446_v41 = vpop.f32.mrf.mxu1 }
 0x30c   : > { %v1447_v42 = vpop.f32.mrf.mxu1 }
 0x30d   : > { %v1448_v46 = vadd.f32 %v1447_v42, %v1446_v41 }
 0x30e   : > { %v1449_v1 = vpop.f32.mrf.mxu1 }
 0x310   : > { %v1450_v43 = vpop.f32.mrf.mxu1 }
 0x31b   : > { %v1424_v44 = vpop.f32.mrf.mxu0 }
 0x31d   : > { %v1425_v45 = vpop.f32.mrf.mxu0 }
 0x31e   : > { %v1426_v47 = vadd.f32 %v1425_v45, %v1424_v44 }
 0x31f   : > { %v1427_v48 = vpop.f32.mrf.mxu0 }
 0x320   : > { %v1162_v49 = vadd.f32 %v1448_v46, %v1426_v47 }
 0x321   : > { %v1428_v51 = vpop.f32.mrf.mxu0 }
 0x322   : > { %v1167_v52 = vadd.f32 %v1162_v49, %v830_v50 }
 0x324   : > { %1168 = vst.msk [vmem:[#allocation3] sm:$0xff] %vm670_vm5, %v1167_v52 }
 0x32b   : > { %v1169_v54 = vld [vmem:[#allocation3] sm:$0xff] }
 0x32c   : > { %vm1170_vm6 = vcmp.gt.f32.partialorder %v1169_v54, 0.0  ;;  %v1172_v55 = vmul.f32 %v1171_v53, %v1169_v54 }
 0x32e   : > { %v1173_v56 = vsel %vm1170_vm6, %v1169_v54, %v1172_v55 }
 0x32f   : > { %v1174_v57 = vpack.c.bf16 %v1173_v56, %v1173_v56 }
 0x331   : > { %1485 = vmatmul.mubr.msk.bf16.vlgmr.msra.gmra.mxu0 %vm670_vm5, %v1174_v57 }
 0x3f1   : > { %v1227_v59 = vpop.f32.mrf.mxu0 }
 0x3f2   : > { %v1228_v60 = vadd.f32 %v1390_v58, %v1227_v59 }
 0x3f3   : > { %v1486_v61 = vpop.f32.mrf.mxu0 }
 0x3f4   : > { %1233 = vst [vmem:[%s430_s1] sm:$0xff] %v1228_v60 }
 0x3f5   : > { %v1230_v62 = vpop.f32.mrf.mxu0 }
 0x3f6   : > { %1641 = shalt.err (!%p1638_p3)
}
 0x3f7   : > { %s1642_s0 = scalar_lea.hbm %s2072_s19, 128  ;;  %s1646_s18 = scalar_lea.hbm %s2130_s12, 256 }
 0x3f8   : > { %p1643_p5 = scmp.ne.s32.totalorder %s2072_s19, %s1642_s0  ;;  %p1647_p9 = scmp.lt.s32.totalorder %s2072_s19, %s2130_s12 }
 0x3f9   : > { %p1648_p10 = scmp.lt.s32.totalorder %s1646_s18, %s1642_s0 }
 0x3fa   : > { %p1644_p6 = pnand %p1643_p5, %p1823_p4 }
 0x3fb   : > { %p1649_p11 = por %p1648_p10, %p1647_p9 }
 0x3fc   : > { %p1645_p7 = pneg %p1644_p6 }
 0x3fe   : > { %p1650_p12 = pnand %p1649_p11, %p1645_p7 }
 0x400   : > { %1653 = shalt.err (!%p1650_p12)
}
 0x401   : > { %1492 = dma.vmem_to_hbm [thread:$0]  (%p1823_p4), %s2074_s27, 128, %s2072_s19, %s1235_s28   ;;  %v1487_v63 = vpop.f32.mrf.mxu0 }
 0x402 PF: > { %p1504_p13 = scmp.ge.s32.totalorder %s1708_s26, 2  ;;  %s1260_s30 = sand.u32 1, %s1688_s21  }
 0x403   : > { %s1261_s2 = scalar_lea.sflag [#allocation5], %s1260_s30 }
 0x404   : > { %p1499_p0 = pnand %p1504_p13, %p1830_p8 }
 0x406   : > { %p1500_p1 = pneg %p1499_p0 }
 0x408   : > { %1683 = dma.done.wait (%p1500_p1), %s1261_s2, 128  }
 0x409   : > { %1685 = vsyncadd (%p1500_p1), %s1261_s2, 4294967168  ;;  %s26_s26 = sadd.s32 1, %s1708_s26   ;;  %s2141_s21 = smov %s1692_s22 }
 0x40a   : > { %p23_p2 = scmp.ge.s32.totalorder %s26_s26, 4   ;;  %s2142_s22 = smov %s1696_s23 }
 0x40b   : > { %s2143_s23 = smov %s1836_s16  ;;  %s2144_s24 = smov %s1704_s25 }
 0x40c   : > { %s2145_s25 = smov %s2147_s29  ;;  %25 = sbr.rel (!%p23_p2) target bundleno = 9 (0x9), region = 108 }
 0x411   :  { %1266 = vsyncpa [#allocation5], 1 }
 0x412   :  { %1268 = vsyncpa [#allocation5 + $0x1], 1 }
 0x413   :  { %1269 = vsyncpa [#allocation6], 1 }
 0x414   :  { %1271 = vsyncpa [#allocation6 + $0x1], 1 }

</bundles_post_ra>
